<compile_context>
chip_gen: v6e
topology: v6e:2x2x1
jax: 0.10.0
libtpu: 0.0.40
codegen_flags: <defaults>
</compile_context>

<pallas_src>
import functools

import jax
import jax.numpy as jnp
import numpy as np
from jax.experimental import pallas as pl
from jax.experimental.pallas import tpu as pltpu

EPS = 1e-5
_MXU_DTYPE = jnp.bfloat16   # MXU operand dtype; accumulation stays f32


# ---------------------------------------------------------------------------
# In-kernel helpers (VMEM-resident arrays in (N*H, W*C) flat, lane-dense layout)
# ---------------------------------------------------------------------------
def _bn_relu_flat(a, gamma_t, beta_t, pool, inv_count):
    """Training-mode BatchNorm + ReLU on a (N*H, W*C) flat activation.

    One-pass statistics: colsum and colsum-of-squares are stacked into a
    (2, W*C) matrix and reduced with a single pool matmul.  `pool` is the
    (W*C, W*C) 0/1 channel-match matrix (pool[i, j] = 1 iff lanes i and j hold
    the same channel), so `stats @ pool * inv_count` gives per-channel
    mean / E[x^2] already broadcast back into the interleaved lane layout.
    Everything stays f32; var = E[x^2] - mean^2 is clamped at 0.
    """
    ssum = jnp.sum(a, axis=0, keepdims=True)                     # (1, W*C)
    ssq = jnp.sum(a * a, axis=0, keepdims=True)                  # (1, W*C)
    stats = jnp.concatenate([ssum, ssq], axis=0)                 # (2, W*C)
    pooled = jnp.dot(stats, pool,
                     preferred_element_type=jnp.float32) * inv_count
    mean = pooled[0:1, :]
    var = jnp.maximum(pooled[1:2, :] - mean * mean, 0.0)
    scale = gamma_t * jax.lax.rsqrt(var + EPS)
    return jnp.maximum((a - mean) * scale + beta_t, 0.0)


def _conv3x3_flat(a, bw_ref, y_in_img, H):
    """3x3 'same' conv as 3 banded MXU matmuls on the (N*H, W*Cin) flat layout.

    bw_ref[ky] is a bf16 (W*Cin, W*Cout_total) band with the kx taps and the
    W zero-padding folded in; the ky row taps are realized with pltpu.roll
    (XLU) plus image-boundary masks (no pad / unaligned sublane slices).
    """
    nh = a.shape[0]
    acc = None
    for ky in range(3):                                  # static unroll
        if ky == 1:
            tap = a
        else:
            tap = pltpu.roll(a, shift=(1 - ky) % nh, axis=0)
            if ky == 0:
                tap = jnp.where(y_in_img >= 1, tap, 0.0)        # y-1 must be >= 0
            else:
                tap = jnp.where(y_in_img <= H - 2, tap, 0.0)    # y+1 must be < H
        d = jnp.dot(tap.astype(_MXU_DTYPE), bw_ref[ky],
                    preferred_element_type=jnp.float32)
        acc = d if acc is None else acc + d
    return acc


# ---------------------------------------------------------------------------
# Fused residual-block kernels (single grid step; everything stays in VMEM)
# ---------------------------------------------------------------------------
def _resblock_kernel_resample(x_ref, bw1_ref, bw2_ref, bw3_ref, bwr_ref,
                              e1_ref, e2_ref, pool1_ref, pool2_ref, pool3_ref,
                              g1_ref, b1_ref, g2_ref, b2_ref, g3_ref, b3_ref,
                              gr_ref, br_ref, o_ref, *, H, inv_count):
    x = x_ref[...]
    nh = x.shape[0]
    y_in_img = jax.lax.broadcasted_iota(jnp.int32, (nh, 1), 0) % H

    # bn1 -> relu -> conv1 (compact layout: it feeds bn2)
    a1 = _bn_relu_flat(x, g1_ref[...], b1_ref[...], pool1_ref[...], inv_count)
    out1 = _conv3x3_flat(a1, bw1_ref, y_in_img, H)               # (NH, W*C1)
    # place out1 into its channel slice of the wide output (0/1 expansion, bf16)
    acc = jnp.dot(out1.astype(_MXU_DTYPE), e1_ref[...],
                  preferred_element_type=jnp.float32)

    # bn2 -> relu -> conv2
    a2 = _bn_relu_flat(out1, g2_ref[...], b2_ref[...], pool2_ref[...], inv_count)
    out2 = _conv3x3_flat(a2, bw2_ref, y_in_img, H)               # (NH, W*C2)
    acc = acc + jnp.dot(out2.astype(_MXU_DTYPE), e2_ref[...],
                        preferred_element_type=jnp.float32)

    # bn3 -> relu -> conv3 (bands already offset into the final channel slice)
    a3 = _bn_relu_flat(out2, g3_ref[...], b3_ref[...], pool3_ref[...], inv_count)
    acc = acc + _conv3x3_flat(a3, bw3_ref, y_in_img, H)          # (NH, W*COUT)

    # resample path: bn -> relu -> 1x1 conv (block-diagonal banded matmul)
    ar = _bn_relu_flat(x, gr_ref[...], br_ref[...], pool1_ref[...], inv_count)
    acc = acc + jnp.dot(ar.astype(_MXU_DTYPE), bwr_ref[...],
                        preferred_element_type=jnp.float32)

    o_ref[...] = acc                                             # one lane-dense store


def _resblock_kernel_identity(x_ref, bw1_ref, bw2_ref, bw3_ref,
                              e1_ref, e2_ref, pool1_ref, pool2_ref, pool3_ref,
                              g1_ref, b1_ref, g2_ref, b2_ref, g3_ref, b3_ref,
                              o_ref, *, H, inv_count):
    x = x_ref[...]
    nh = x.shape[0]
    y_in_img = jax.lax.broadcasted_iota(jnp.int32, (nh, 1), 0) % H

    a1 = _bn_relu_flat(x, g1_ref[...], b1_ref[...], pool1_ref[...], inv_count)
    out1 = _conv3x3_flat(a1, bw1_ref, y_in_img, H)
    acc = jnp.dot(out1.astype(_MXU_DTYPE), e1_ref[...],
                  preferred_element_type=jnp.float32)

    a2 = _bn_relu_flat(out1, g2_ref[...], b2_ref[...], pool2_ref[...], inv_count)
    out2 = _conv3x3_flat(a2, bw2_ref, y_in_img, H)
    acc = acc + jnp.dot(out2.astype(_MXU_DTYPE), e2_ref[...],
                        preferred_element_type=jnp.float32)

    a3 = _bn_relu_flat(out2, g3_ref[...], b3_ref[...], pool3_ref[...], inv_count)
    acc = acc + _conv3x3_flat(a3, bw3_ref, y_in_img, H)

    o_ref[...] = acc + x                         # identity residual (C_IN == C_OUT)


# ---------------------------------------------------------------------------
# Operand preparation (plain JAX, hoisted out of the per-call forward;
# run ONCE per weight update)
# ---------------------------------------------------------------------------
def _banded_conv3x3_weight(w_hwio, W, cout_total=None, cout_offset=0):
    """(3,3,Cin,Cout) HWIO weights -> (3, W*Cin, W*cout_total) banded matrices.

    big[ky][xin*Cin + ci, xout*cout_total + cout_offset + co] = w[ky, kx, ci, co]
    with xin = xout + kx - 1 (zero outside the band => 'same' padding along W).
    """
    kh, kw, cin, cout = w_hwio.shape
    if cout_total is None:
        cout_total = cout
    mats = []
    for ky in range(kh):
        m = jnp.zeros((W * cin, W * cout_total), jnp.float32)
        for kx in range(kw):
            blk = jnp.zeros((cin, cout_total), jnp.float32)
            blk = blk.at[:, cout_offset:cout_offset + cout].set(w_hwio[ky, kx])
            m = m + jnp.kron(jnp.eye(W, k=1 - kx, dtype=jnp.float32), blk)
        mats.append(m)
    return jnp.stack(mats, axis=0)


def _channel_expand(c_small, c_total, offset, W):
    """0/1 matrix (W*c_small, W*c_total): places channel c at c+offset for each x."""
    sel = jnp.zeros((c_small, c_total), jnp.float32)
    sel = sel.at[:, offset:offset + c_small].set(jnp.eye(c_small, dtype=jnp.float32))
    return jnp.kron(jnp.eye(W, dtype=jnp.float32), sel)


def _channel_match(c, W):
    """(W*c, W*c) 0/1 matrix: 1 where lane i and lane j hold the same channel."""
    j = np.arange(W * c)
    return jnp.asarray((j[:, None] % c == j[None, :] % c).astype(np.float32))


def prepare_operands(params, in_planes, out_planes, W):
    """Build bf16 banded weights / placement matrices and f32 pool / BN operands."""
    c1, c2, c3 = out_planes // 2, out_planes // 4, out_planes // 4
    assert c1 + c2 + c3 == out_planes
    tile = lambda v: jnp.tile(v.astype(jnp.float32), (1, W))     # (1,C)->(1,W*C)
    ops = {
        "bw1": _banded_conv3x3_weight(params["w1"], W).astype(_MXU_DTYPE),
        "bw2": _banded_conv3x3_weight(params["w2"], W).astype(_MXU_DTYPE),
        "bw3": _banded_conv3x3_weight(params["w3"], W, cout_total=out_planes,
                                      cout_offset=c1 + c2).astype(_MXU_DTYPE),
        "e1": _channel_expand(c1, out_planes, 0, W).astype(_MXU_DTYPE),
        "e2": _channel_expand(c2, out_planes, c1, W).astype(_MXU_DTYPE),
        "pool1": _channel_match(in_planes, W),
        "pool2": _channel_match(c1, W),
        "pool3": _channel_match(c2, W),
        "g1": tile(params["g1"]), "b1": tile(params["b1"]),
        "g2": tile(params["g2"]), "b2": tile(params["b2"]),
        "g3": tile(params["g3"]), "b3": tile(params["b3"]),
    }
    if in_planes != out_planes:
        ops["bwr"] = jnp.kron(jnp.eye(W, dtype=jnp.float32),
                              params["wr"]).astype(_MXU_DTYPE)   # (W*Cin, W*COUT)
        ops["gr"] = tile(params["gr"])
        ops["br"] = tile(params["br"])
    return ops


# ---------------------------------------------------------------------------
# Forward (jitted; only reshapes x and launches the fused kernel)
# ---------------------------------------------------------------------------
def _residual_block_forward(x_nchw, ops, in_planes, out_planes):
    n, cin, h, w = x_nchw.shape
    assert cin == in_planes
    # NCHW -> NHWC -> lane-dense flat (N*H, W*Cin)
    x_flat = jnp.transpose(x_nchw, (0, 2, 3, 1)).astype(jnp.float32).reshape(n * h, w * cin)
    inv_count = 1.0 / float(n * h * w)

    out_shape = jax.ShapeDtypeStruct((n * h, w * out_planes), jnp.float32)
    cparams = pltpu.CompilerParams(vmem_limit_bytes=32 * 1024 * 1024)

    if in_planes != out_planes:
        o_flat = pl.pallas_call(
            functools.partial(_resblock_kernel_resample, H=h, inv_count=inv_count),
            out_shape=out_shape,
            compiler_params=cparams,
        )(x_flat, ops["bw1"], ops["bw2"], ops["bw3"], ops["bwr"],
          ops["e1"], ops["e2"], ops["pool1"], ops["pool2"], ops["pool3"],
          ops["g1"], ops["b1"], ops["g2"], ops["b2"], ops["g3"], ops["b3"],
          ops["gr"], ops["br"])
    else:
        o_flat = pl.pallas_call(
            functools.partial(_resblock_kernel_identity, H=h, inv_count=inv_count),
            out_shape=out_shape,
            compiler_params=cparams,
        )(x_flat, ops["bw1"], ops["bw2"], ops["bw3"],
          ops["e1"], ops["e2"], ops["pool1"], ops["pool2"], ops["pool3"],
          ops["g1"], ops["b1"], ops["g2"], ops["b2"], ops["g3"], ops["b3"])

    return jnp.transpose(o_flat.reshape(n, h, w, out_planes), (0, 3, 1, 2))  # back to NCHW


residual_block_forward = jax.jit(_residual_block_forward, static_argnums=(2, 3))


# ---------------------------------------------------------------------------
# Parameter setup
# ---------------------------------------------------------------------------
def init_params(key, in_planes, out_planes):
    c1, c2, c3 = out_planes // 2, out_planes // 4, out_planes // 4
    ks = jax.random.split(key, 4)
    p = {
        # conv weights stored HWIO; PyTorch OIHW weights map via transpose(2, 3, 1, 0)
        "w1": jax.random.normal(ks[0], (3, 3, in_planes, c1), jnp.float32) * 0.1,
        "w2": jax.random.normal(ks[1], (3, 3, c1, c2), jnp.float32) * 0.1,
        "w3": jax.random.normal(ks[2], (3, 3, c2, c3), jnp.float32) * 0.1,
        # BatchNorm affine params (PyTorch default init: gamma=1, beta=0)
        "g1": jnp.ones((1, in_planes), jnp.float32), "b1": jnp.zeros((1, in_planes), jnp.float32),
        "g2": jnp.ones((1, c1), jnp.float32),        "b2": jnp.zeros((1, c1), jnp.float32),
        "g3": jnp.ones((1, c2), jnp.float32),        "b3": jnp.zeros((1, c2), jnp.float32),
    }
    if in_planes != out_planes:
        p["wr"] = jax.random.normal(ks[3], (in_planes, out_planes), jnp.float32) * 0.1
        p["gr"] = jnp.ones((1, in_planes), jnp.float32)
        p["br"] = jnp.zeros((1, in_planes), jnp.float32)
    return p


# ---------------------------------------------------------------------------
# Pure-JAX reference (ground truth for the correctness check)
# ---------------------------------------------------------------------------
def _ref_bn_relu(x, gamma, beta):
    m = jnp.mean(x, axis=(0, 1, 2), keepdims=True)
    v = jnp.mean(jnp.square(x - m), axis=(0, 1, 2), keepdims=True)
    return jnp.maximum((x - m) / jnp.sqrt(v + EPS) * gamma.reshape(1, 1, 1, -1)
                       + beta.reshape(1, 1, 1, -1), 0.0)


def _ref_conv(x, w, pad):
    return jax.lax.conv_general_dilated(
        x, w, window_strides=(1, 1), padding=[(pad, pad), (pad, pad)],
        dimension_numbers=("NHWC", "HWIO", "NHWC"))


def residual_block_reference(x_nchw, params, in_planes, out_planes):
    x = jnp.transpose(x_nchw, (0, 2, 3, 1)).astype(jnp.float32)
    out1 = _ref_conv(_ref_bn_relu(x, params["g1"], params["b1"]), params["w1"], 1)
    out2 = _ref_conv(_ref_bn_relu(out1, params["g2"], params["b2"]), params["w2"], 1)
    out3 = _ref_conv(_ref_bn_relu(out2, params["g3"], params["b3"]), params["w3"], 1)
    cat = jnp.concatenate([out1, out2, out3], axis=-1)
    if in_planes != out_planes:
        residual = _ref_conv(_ref_bn_relu(x, params["gr"], params["br"]),
                             params["wr"].reshape(1, 1, in_planes, out_planes), 0)
    else:
        residual = x
    return jnp.transpose(cat + residual, (0, 3, 1, 2))


if __name__ == "__main__":
    N, C_IN, C_OUT, H, W = 2, 4, 16, 16, 16
    key = jax.random.PRNGKey(0)
    kx1, kp1, kx2, kp2 = jax.random.split(key, 4)

    # ---- resample path (in_planes != out_planes) -------------------------
    x = jax.random.normal(kx1, (N, C_IN, H, W), jnp.float32)      # NCHW like PyTorch
    params = init_params(kp1, C_IN, C_OUT)
    ops = prepare_operands(params, C_IN, C_OUT, W)                # once per weight update
    out = jax.block_until_ready(residual_block_forward(x, ops, C_IN, C_OUT))
    assert out.shape == (N, C_OUT, H, W), out.shape
    ref = jax.block_until_ready(residual_block_reference(x, params, C_IN, C_OUT))
    # tolerance accounts for bf16 MXU operands (accumulation is f32)
    np.testing.assert_allclose(np.asarray(out), np.asarray(ref), rtol=2e-2, atol=2e-2)

    # ---- identity path (in_planes == out_planes) -------------------------
    x_eq = jax.random.normal(kx2, (N, C_OUT, H, W), jnp.float32)
    params_eq = init_params(kp2, C_OUT, C_OUT)
    ops_eq = prepare_operands(params_eq, C_OUT, C_OUT, W)
    out_eq = jax.block_until_ready(residual_block_forward(x_eq, ops_eq, C_OUT, C_OUT))
    assert out_eq.shape == (N, C_OUT, H, W), out_eq.shape
    ref_eq = jax.block_until_ready(residual_block_reference(x_eq, params_eq, C_OUT, C_OUT))
    np.testing.assert_allclose(np.asarray(out_eq), np.asarray(ref_eq), rtol=2e-2, atol=2e-2)

    print("KERNEL_OK")
</pallas_src>

<mosaic_0001>
module attributes {stable_mosaic.version = 11 : i64} {
  func.func @_resblock_kernel_resample(%arg0: memref<32x64xf32, #tpu.memory_space<vmem>>, %arg1: memref<3x64x128xbf16, #tpu.memory_space<vmem>>, %arg2: memref<3x128x64xbf16, #tpu.memory_space<vmem>>, %arg3: memref<3x64x256xbf16, #tpu.memory_space<vmem>>, %arg4: memref<64x256xbf16, #tpu.memory_space<vmem>>, %arg5: memref<128x256xbf16, #tpu.memory_space<vmem>>, %arg6: memref<64x256xbf16, #tpu.memory_space<vmem>>, %arg7: memref<64x64xf32, #tpu.memory_space<vmem>>, %arg8: memref<128x128xf32, #tpu.memory_space<vmem>>, %arg9: memref<64x64xf32, #tpu.memory_space<vmem>>, %arg10: memref<1x64xf32, #tpu.memory_space<vmem>>, %arg11: memref<1x64xf32, #tpu.memory_space<vmem>>, %arg12: memref<1x128xf32, #tpu.memory_space<vmem>>, %arg13: memref<1x128xf32, #tpu.memory_space<vmem>>, %arg14: memref<1x64xf32, #tpu.memory_space<vmem>>, %arg15: memref<1x64xf32, #tpu.memory_space<vmem>>, %arg16: memref<1x64xf32, #tpu.memory_space<vmem>>, %arg17: memref<1x64xf32, #tpu.memory_space<vmem>>, %arg18: memref<32x256xf32, #tpu.memory_space<vmem>>) attributes {dimension_semantics = [], scalar_prefetch = 0 : i64, scratch_operands = 0 : i64, tpu.core_type = #tpu.core_type<tc>} {
    %c0 = arith.constant 0 : index
    %c0_0 = arith.constant 0 : index
    %0 = vector.load %arg0[%c0, %c0_0] : memref<32x64xf32, #tpu.memory_space<vmem>>, vector<32x64xf32>
    %1 = tpu.iota {dimensions = array<i32: 0>} : vector<32x1xi32>
    %c16_i32 = arith.constant 16 : i32
    %c0_i32 = arith.constant 0 : i32
    %2 = arith.cmpi eq, %c16_i32, %c0_i32 : i32
    %c1_i32 = arith.constant 1 : i32
    %3 = arith.select %2, %c1_i32, %c16_i32 : i32
    %4 = vector.broadcast %3 : i32 to vector<32x1xi32>
    %5 = arith.remsi %1, %4 : vector<32x1xi32>
    %c0_i32_1 = arith.constant 0 : i32
    %6 = vector.broadcast %c0_i32_1 : i32 to vector<32x1xi32>
    %7 = arith.cmpi ne, %5, %6 : vector<32x1xi32>
    %c0_i32_2 = arith.constant 0 : i32
    %8 = vector.broadcast %c0_i32_2 : i32 to vector<32x1xi32>
    %9 = arith.cmpi slt, %5, %8 : vector<32x1xi32>
    %c0_i32_3 = arith.constant 0 : i32
    %10 = arith.cmpi slt, %3, %c0_i32_3 : i32
    %11 = vector.broadcast %10 : i1 to vector<32x1xi1>
    %12 = vector.broadcast %11 : vector<32x1xi1> to vector<32x1xi1>
    %13 = arith.xori %9, %12 : vector<32x1xi1>
    %14 = arith.andi %13, %7 : vector<32x1xi1>
    %15 = vector.broadcast %3 : i32 to vector<32x1xi32>
    %16 = arith.addi %5, %15 : vector<32x1xi32>
    %17 = arith.select %14, %16, %5 : vector<32x1xi1>, vector<32x1xi32>
    %c0_4 = arith.constant 0 : index
    %c0_5 = arith.constant 0 : index
    %18 = vector.load %arg10[%c0_4, %c0_5] : memref<1x64xf32, #tpu.memory_space<vmem>>, vector<1x64xf32>
    %c0_6 = arith.constant 0 : index
    %c0_7 = arith.constant 0 : index
    %19 = vector.load %arg11[%c0_6, %c0_7] : memref<1x64xf32, #tpu.memory_space<vmem>>, vector<1x64xf32>
    %c0_8 = arith.constant 0 : index
    %c0_9 = arith.constant 0 : index
    %20 = vector.load %arg7[%c0_8, %c0_9] : memref<64x64xf32, #tpu.memory_space<vmem>>, vector<64x64xf32>
    %cst = arith.constant dense<0.000000e+00> : vector<64xf32>
    %21 = vector.multi_reduction <add>, %0, %cst [0] : vector<32x64xf32> to vector<64xf32>
    %22 = vector.shape_cast %21 : vector<64xf32> to vector<1x64xf32>
    %23 = arith.mulf %0, %0 : vector<32x64xf32>
    %cst_10 = arith.constant dense<0.000000e+00> : vector<64xf32>
    %24 = vector.multi_reduction <add>, %23, %cst_10 [0] : vector<32x64xf32> to vector<64xf32>
    %25 = vector.shape_cast %24 : vector<64xf32> to vector<1x64xf32>
    %26 = tpu.concatenate %22, %25 in 0 : vector<1x64xf32>, vector<1x64xf32> -> vector<2x64xf32>
    %cst_11 = arith.constant dense<0.000000e+00> : vector<2x64xf32>
    %27 = tpu.matmul %26, %20, %cst_11 {dimension_numbers = #tpu.dot_dimension_numbers<[1], [0], [0], [1], [0, 0, 1, 1], [], []>} : vector<2x64xf32>, vector<64x64xf32>, vector<2x64xf32> -> vector<2x64xf32>
    %cst_12 = arith.constant 0.001953125 : f32
    %28 = vector.broadcast %cst_12 : f32 to vector<2x64xf32>
    %29 = arith.mulf %27, %28 : vector<2x64xf32>
    %30 = vector.extract_strided_slice %29 {offsets = [0, 0], sizes = [1, 64], strides = [1, 1]} : vector<2x64xf32> to vector<1x64xf32>
    %31 = vector.extract_strided_slice %29 {offsets = [1, 0], sizes = [1, 64], strides = [1, 1]} : vector<2x64xf32> to vector<1x64xf32>
    %32 = arith.mulf %30, %30 : vector<1x64xf32>
    %33 = arith.subf %31, %32 : vector<1x64xf32>
    %cst_13 = arith.constant 0.000000e+00 : f32
    %34 = vector.broadcast %cst_13 : f32 to vector<1x64xf32>
    %35 = arith.maximumf %33, %34 : vector<1x64xf32>
    %cst_14 = arith.constant 9.99999974E-6 : f32
    %36 = vector.broadcast %cst_14 : f32 to vector<1x64xf32>
    %37 = arith.addf %35, %36 : vector<1x64xf32>
    %38 = math.rsqrt %37 : vector<1x64xf32>
    %39 = arith.mulf %18, %38 : vector<1x64xf32>
    %40 = vector.broadcast %30 : vector<1x64xf32> to vector<32x64xf32>
    %41 = arith.subf %0, %40 : vector<32x64xf32>
    %42 = vector.broadcast %39 : vector<1x64xf32> to vector<32x64xf32>
    %43 = arith.mulf %41, %42 : vector<32x64xf32>
    %44 = vector.broadcast %19 : vector<1x64xf32> to vector<32x64xf32>
    %45 = arith.addf %43, %44 : vector<32x64xf32>
    %cst_15 = arith.constant 0.000000e+00 : f32
    %46 = vector.broadcast %cst_15 : f32 to vector<32x64xf32>
    %47 = arith.maximumf %45, %46 : vector<32x64xf32>
    %c1_i32_16 = arith.constant 1 : i32
    %48 = tpu.dynamic_rotate %47 by %c1_i32_16 dim 0 : vector<32x64xf32>, i32 -> vector<32x64xf32>
    %c1_i32_17 = arith.constant 1 : i32
    %49 = vector.broadcast %c1_i32_17 : i32 to vector<32x1xi32>
    %50 = arith.cmpi sge, %17, %49 : vector<32x1xi32>
    %cst_18 = arith.constant 0.000000e+00 : f32
    %51 = vector.shape_cast %50 : vector<32x1xi1> to vector<32x1xi1>
    %52 = vector.broadcast %51 : vector<32x1xi1> to vector<32x64xi1>
    %53 = vector.broadcast %cst_18 : f32 to vector<32x64xf32>
    %54 = arith.select %52, %48, %53 : vector<32x64xi1>, vector<32x64xf32>
    %55 = arith.truncf %54 : vector<32x64xf32> to vector<32x64xbf16>
    %c0_19 = arith.constant 0 : index
    %c0_20 = arith.constant 0 : index
    %c0_21 = arith.constant 0 : index
    %56 = vector.load %arg1[%c0_19, %c0_20, %c0_21] : memref<3x64x128xbf16, #tpu.memory_space<vmem>>, vector<1x64x128xbf16>
    %57 = vector.shape_cast %56 : vector<1x64x128xbf16> to vector<64x128xbf16>
    %cst_22 = arith.constant dense<0.000000e+00> : vector<32x128xf32>
    %58 = tpu.matmul %55, %57, %cst_22 {dimension_numbers = #tpu.dot_dimension_numbers<[1], [0], [0], [1], [0, 0, 1, 1], [], []>} : vector<32x64xbf16>, vector<64x128xbf16>, vector<32x128xf32> -> vector<32x128xf32>
    %59 = arith.truncf %47 : vector<32x64xf32> to vector<32x64xbf16>
    %c1 = arith.constant 1 : index
    %c0_23 = arith.constant 0 : index
    %c0_24 = arith.constant 0 : index
    %60 = vector.load %arg1[%c1, %c0_23, %c0_24] : memref<3x64x128xbf16, #tpu.memory_space<vmem>>, vector<1x64x128xbf16>
    %61 = vector.shape_cast %60 : vector<1x64x128xbf16> to vector<64x128xbf16>
    %cst_25 = arith.constant dense<0.000000e+00> : vector<32x128xf32>
    %62 = tpu.matmul %59, %61, %cst_25 {dimension_numbers = #tpu.dot_dimension_numbers<[1], [0], [0], [1], [0, 0, 1, 1], [], []>} : vector<32x64xbf16>, vector<64x128xbf16>, vector<32x128xf32> -> vector<32x128xf32>
    %63 = arith.addf %58, %62 : vector<32x128xf32>
    %c31_i32 = arith.constant 31 : i32
    %64 = tpu.dynamic_rotate %47 by %c31_i32 dim 0 : vector<32x64xf32>, i32 -> vector<32x64xf32>
    %c14_i32 = arith.constant 14 : i32
    %65 = vector.broadcast %c14_i32 : i32 to vector<32x1xi32>
    %66 = arith.cmpi sle, %17, %65 : vector<32x1xi32>
    %cst_26 = arith.constant 0.000000e+00 : f32
    %67 = vector.shape_cast %66 : vector<32x1xi1> to vector<32x1xi1>
    %68 = vector.broadcast %67 : vector<32x1xi1> to vector<32x64xi1>
    %69 = vector.broadcast %cst_26 : f32 to vector<32x64xf32>
    %70 = arith.select %68, %64, %69 : vector<32x64xi1>, vector<32x64xf32>
    %71 = arith.truncf %70 : vector<32x64xf32> to vector<32x64xbf16>
    %c2 = arith.constant 2 : index
    %c0_27 = arith.constant 0 : index
    %c0_28 = arith.constant 0 : index
    %72 = vector.load %arg1[%c2, %c0_27, %c0_28] : memref<3x64x128xbf16, #tpu.memory_space<vmem>>, vector<1x64x128xbf16>
    %73 = vector.shape_cast %72 : vector<1x64x128xbf16> to vector<64x128xbf16>
    %cst_29 = arith.constant dense<0.000000e+00> : vector<32x128xf32>
    %74 = tpu.matmul %71, %73, %cst_29 {dimension_numbers = #tpu.dot_dimension_numbers<[1], [0], [0], [1], [0, 0, 1, 1], [], []>} : vector<32x64xbf16>, vector<64x128xbf16>, vector<32x128xf32> -> vector<32x128xf32>
    %75 = arith.addf %63, %74 : vector<32x128xf32>
    %76 = arith.truncf %75 : vector<32x128xf32> to vector<32x128xbf16>
    %c0_30 = arith.constant 0 : index
    %c0_31 = arith.constant 0 : index
    %77 = vector.load %arg5[%c0_30, %c0_31] : memref<128x256xbf16, #tpu.memory_space<vmem>>, vector<128x256xbf16>
    %cst_32 = arith.constant dense<0.000000e+00> : vector<32x256xf32>
    %78 = tpu.matmul %76, %77, %cst_32 {dimension_numbers = #tpu.dot_dimension_numbers<[1], [0], [0], [1], [0, 0, 1, 1], [], []>} : vector<32x128xbf16>, vector<128x256xbf16>, vector<32x256xf32> -> vector<32x256xf32>
    %c0_33 = arith.constant 0 : index
    %c0_34 = arith.constant 0 : index
    %79 = vector.load %arg12[%c0_33, %c0_34] : memref<1x128xf32, #tpu.memory_space<vmem>>, vector<1x128xf32>
    %c0_35 = arith.constant 0 : index
    %c0_36 = arith.constant 0 : index
    %80 = vector.load %arg13[%c0_35, %c0_36] : memref<1x128xf32, #tpu.memory_space<vmem>>, vector<1x128xf32>
    %c0_37 = arith.constant 0 : index
    %c0_38 = arith.constant 0 : index
    %81 = vector.load %arg8[%c0_37, %c0_38] : memref<128x128xf32, #tpu.memory_space<vmem>>, vector<128x128xf32>
    %cst_39 = arith.constant dense<0.000000e+00> : vector<128xf32>
    %82 = vector.multi_reduction <add>, %75, %cst_39 [0] : vector<32x128xf32> to vector<128xf32>
    %83 = vector.shape_cast %82 : vector<128xf32> to vector<1x128xf32>
    %84 = arith.mulf %75, %75 : vector<32x128xf32>
    %cst_40 = arith.constant dense<0.000000e+00> : vector<128xf32>
    %85 = vector.multi_reduction <add>, %84, %cst_40 [0] : vector<32x128xf32> to vector<128xf32>
    %86 = vector.shape_cast %85 : vector<128xf32> to vector<1x128xf32>
    %87 = tpu.concatenate %83, %86 in 0 : vector<1x128xf32>, vector<1x128xf32> -> vector<2x128xf32>
    %cst_41 = arith.constant dense<0.000000e+00> : vector<2x128xf32>
    %88 = tpu.matmul %87, %81, %cst_41 {dimension_numbers = #tpu.dot_dimension_numbers<[1], [0], [0], [1], [0, 0, 1, 1], [], []>} : vector<2x128xf32>, vector<128x128xf32>, vector<2x128xf32> -> vector<2x128xf32>
    %cst_42 = arith.constant 0.001953125 : f32
    %89 = vector.broadcast %cst_42 : f32 to vector<2x128xf32>
    %90 = arith.mulf %88, %89 : vector<2x128xf32>
    %91 = vector.extract_strided_slice %90 {offsets = [0, 0], sizes = [1, 128], strides = [1, 1]} : vector<2x128xf32> to vector<1x128xf32>
    %92 = vector.extract_strided_slice %90 {offsets = [1, 0], sizes = [1, 128], strides = [1, 1]} : vector<2x128xf32> to vector<1x128xf32>
    %93 = arith.mulf %91, %91 : vector<1x128xf32>
    %94 = arith.subf %92, %93 : vector<1x128xf32>
    %cst_43 = arith.constant 0.000000e+00 : f32
    %95 = vector.broadcast %cst_43 : f32 to vector<1x128xf32>
    %96 = arith.maximumf %94, %95 : vector<1x128xf32>
    %cst_44 = arith.constant 9.99999974E-6 : f32
    %97 = vector.broadcast %cst_44 : f32 to vector<1x128xf32>
    %98 = arith.addf %96, %97 : vector<1x128xf32>
    %99 = math.rsqrt %98 : vector<1x128xf32>
    %100 = arith.mulf %79, %99 : vector<1x128xf32>
    %101 = vector.broadcast %91 : vector<1x128xf32> to vector<32x128xf32>
    %102 = arith.subf %75, %101 : vector<32x128xf32>
    %103 = vector.broadcast %100 : vector<1x128xf32> to vector<32x128xf32>
    %104 = arith.mulf %102, %103 : vector<32x128xf32>
    %105 = vector.broadcast %80 : vector<1x128xf32> to vector<32x128xf32>
    %106 = arith.addf %104, %105 : vector<32x128xf32>
    %cst_45 = arith.constant 0.000000e+00 : f32
    %107 = vector.broadcast %cst_45 : f32 to vector<32x128xf32>
    %108 = arith.maximumf %106, %107 : vector<32x128xf32>
    %c1_i32_46 = arith.constant 1 : i32
    %109 = tpu.dynamic_rotate %108 by %c1_i32_46 dim 0 : vector<32x128xf32>, i32 -> vector<32x128xf32>
    %c1_i32_47 = arith.constant 1 : i32
    %110 = vector.broadcast %c1_i32_47 : i32 to vector<32x1xi32>
    %111 = arith.cmpi sge, %17, %110 : vector<32x1xi32>
    %cst_48 = arith.constant 0.000000e+00 : f32
    %112 = vector.shape_cast %111 : vector<32x1xi1> to vector<32x1xi1>
    %113 = vector.broadcast %112 : vector<32x1xi1> to vector<32x128xi1>
    %114 = vector.broadcast %cst_48 : f32 to vector<32x128xf32>
    %115 = arith.select %113, %109, %114 : vector<32x128xi1>, vector<32x128xf32>
    %116 = arith.truncf %115 : vector<32x128xf32> to vector<32x128xbf16>
    %c0_49 = arith.constant 0 : index
    %c0_50 = arith.constant 0 : index
    %c0_51 = arith.constant 0 : index
    %117 = vector.load %arg2[%c0_49, %c0_50, %c0_51] : memref<3x128x64xbf16, #tpu.memory_space<vmem>>, vector<1x128x64xbf16>
    %118 = vector.shape_cast %117 : vector<1x128x64xbf16> to vector<128x64xbf16>
    %cst_52 = arith.constant dense<0.000000e+00> : vector<32x64xf32>
    %119 = tpu.matmul %116, %118, %cst_52 {dimension_numbers = #tpu.dot_dimension_numbers<[1], [0], [0], [1], [0, 0, 1, 1], [], []>} : vector<32x128xbf16>, vector<128x64xbf16>, vector<32x64xf32> -> vector<32x64xf32>
    %120 = arith.truncf %108 : vector<32x128xf32> to vector<32x128xbf16>
    %c1_53 = arith.constant 1 : index
    %c0_54 = arith.constant 0 : index
    %c0_55 = arith.constant 0 : index
    %121 = vector.load %arg2[%c1_53, %c0_54, %c0_55] : memref<3x128x64xbf16, #tpu.memory_space<vmem>>, vector<1x128x64xbf16>
    %122 = vector.shape_cast %121 : vector<1x128x64xbf16> to vector<128x64xbf16>
    %cst_56 = arith.constant dense<0.000000e+00> : vector<32x64xf32>
    %123 = tpu.matmul %120, %122, %cst_56 {dimension_numbers = #tpu.dot_dimension_numbers<[1], [0], [0], [1], [0, 0, 1, 1], [], []>} : vector<32x128xbf16>, vector<128x64xbf16>, vector<32x64xf32> -> vector<32x64xf32>
    %124 = arith.addf %119, %123 : vector<32x64xf32>
    %c31_i32_57 = arith.constant 31 : i32
    %125 = tpu.dynamic_rotate %108 by %c31_i32_57 dim 0 : vector<32x128xf32>, i32 -> vector<32x128xf32>
    %c14_i32_58 = arith.constant 14 : i32
    %126 = vector.broadcast %c14_i32_58 : i32 to vector<32x1xi32>
    %127 = arith.cmpi sle, %17, %126 : vector<32x1xi32>
    %cst_59 = arith.constant 0.000000e+00 : f32
    %128 = vector.shape_cast %127 : vector<32x1xi1> to vector<32x1xi1>
    %129 = vector.broadcast %128 : vector<32x1xi1> to vector<32x128xi1>
    %130 = vector.broadcast %cst_59 : f32 to vector<32x128xf32>
    %131 = arith.select %129, %125, %130 : vector<32x128xi1>, vector<32x128xf32>
    %132 = arith.truncf %131 : vector<32x128xf32> to vector<32x128xbf16>
    %c2_60 = arith.constant 2 : index
    %c0_61 = arith.constant 0 : index
    %c0_62 = arith.constant 0 : index
    %133 = vector.load %arg2[%c2_60, %c0_61, %c0_62] : memref<3x128x64xbf16, #tpu.memory_space<vmem>>, vector<1x128x64xbf16>
    %134 = vector.shape_cast %133 : vector<1x128x64xbf16> to vector<128x64xbf16>
    %cst_63 = arith.constant dense<0.000000e+00> : vector<32x64xf32>
    %135 = tpu.matmul %132, %134, %cst_63 {dimension_numbers = #tpu.dot_dimension_numbers<[1], [0], [0], [1], [0, 0, 1, 1], [], []>} : vector<32x128xbf16>, vector<128x64xbf16>, vector<32x64xf32> -> vector<32x64xf32>
    %136 = arith.addf %124, %135 : vector<32x64xf32>
    %137 = arith.truncf %136 : vector<32x64xf32> to vector<32x64xbf16>
    %c0_64 = arith.constant 0 : index
    %c0_65 = arith.constant 0 : index
    %138 = vector.load %arg6[%c0_64, %c0_65] : memref<64x256xbf16, #tpu.memory_space<vmem>>, vector<64x256xbf16>
    %cst_66 = arith.constant dense<0.000000e+00> : vector<32x256xf32>
    %139 = tpu.matmul %137, %138, %cst_66 {dimension_numbers = #tpu.dot_dimension_numbers<[1], [0], [0], [1], [0, 0, 1, 1], [], []>} : vector<32x64xbf16>, vector<64x256xbf16>, vector<32x256xf32> -> vector<32x256xf32>
    %140 = arith.addf %78, %139 : vector<32x256xf32>
    %c0_67 = arith.constant 0 : index
    %c0_68 = arith.constant 0 : index
    %141 = vector.load %arg14[%c0_67, %c0_68] : memref<1x64xf32, #tpu.memory_space<vmem>>, vector<1x64xf32>
    %c0_69 = arith.constant 0 : index
    %c0_70 = arith.constant 0 : index
    %142 = vector.load %arg15[%c0_69, %c0_70] : memref<1x64xf32, #tpu.memory_space<vmem>>, vector<1x64xf32>
    %c0_71 = arith.constant 0 : index
    %c0_72 = arith.constant 0 : index
    %143 = vector.load %arg9[%c0_71, %c0_72] : memref<64x64xf32, #tpu.memory_space<vmem>>, vector<64x64xf32>
    %cst_73 = arith.constant dense<0.000000e+00> : vector<64xf32>
    %144 = vector.multi_reduction <add>, %136, %cst_73 [0] : vector<32x64xf32> to vector<64xf32>
    %145 = vector.shape_cast %144 : vector<64xf32> to vector<1x64xf32>
    %146 = arith.mulf %136, %136 : vector<32x64xf32>
    %cst_74 = arith.constant dense<0.000000e+00> : vector<64xf32>
    %147 = vector.multi_reduction <add>, %146, %cst_74 [0] : vector<32x64xf32> to vector<64xf32>
    %148 = vector.shape_cast %147 : vector<64xf32> to vector<1x64xf32>
    %149 = tpu.concatenate %145, %148 in 0 : vector<1x64xf32>, vector<1x64xf32> -> vector<2x64xf32>
    %cst_75 = arith.constant dense<0.000000e+00> : vector<2x64xf32>
    %150 = tpu.matmul %149, %143, %cst_75 {dimension_numbers = #tpu.dot_dimension_numbers<[1], [0], [0], [1], [0, 0, 1, 1], [], []>} : vector<2x64xf32>, vector<64x64xf32>, vector<2x64xf32> -> vector<2x64xf32>
    %cst_76 = arith.constant 0.001953125 : f32
    %151 = vector.broadcast %cst_76 : f32 to vector<2x64xf32>
    %152 = arith.mulf %150, %151 : vector<2x64xf32>
    %153 = vector.extract_strided_slice %152 {offsets = [0, 0], sizes = [1, 64], strides = [1, 1]} : vector<2x64xf32> to vector<1x64xf32>
    %154 = vector.extract_strided_slice %152 {offsets = [1, 0], sizes = [1, 64], strides = [1, 1]} : vector<2x64xf32> to vector<1x64xf32>
    %155 = arith.mulf %153, %153 : vector<1x64xf32>
    %156 = arith.subf %154, %155 : vector<1x64xf32>
    %cst_77 = arith.constant 0.000000e+00 : f32
    %157 = vector.broadcast %cst_77 : f32 to vector<1x64xf32>
    %158 = arith.maximumf %156, %157 : vector<1x64xf32>
    %cst_78 = arith.constant 9.99999974E-6 : f32
    %159 = vector.broadcast %cst_78 : f32 to vector<1x64xf32>
    %160 = arith.addf %158, %159 : vector<1x64xf32>
    %161 = math.rsqrt %160 : vector<1x64xf32>
    %162 = arith.mulf %141, %161 : vector<1x64xf32>
    %163 = vector.broadcast %153 : vector<1x64xf32> to vector<32x64xf32>
    %164 = arith.subf %136, %163 : vector<32x64xf32>
    %165 = vector.broadcast %162 : vector<1x64xf32> to vector<32x64xf32>
    %166 = arith.mulf %164, %165 : vector<32x64xf32>
    %167 = vector.broadcast %142 : vector<1x64xf32> to vector<32x64xf32>
    %168 = arith.addf %166, %167 : vector<32x64xf32>
    %cst_79 = arith.constant 0.000000e+00 : f32
    %169 = vector.broadcast %cst_79 : f32 to vector<32x64xf32>
    %170 = arith.maximumf %168, %169 : vector<32x64xf32>
    %c1_i32_80 = arith.constant 1 : i32
    %171 = tpu.dynamic_rotate %170 by %c1_i32_80 dim 0 : vector<32x64xf32>, i32 -> vector<32x64xf32>
    %c1_i32_81 = arith.constant 1 : i32
    %172 = vector.broadcast %c1_i32_81 : i32 to vector<32x1xi32>
    %173 = arith.cmpi sge, %17, %172 : vector<32x1xi32>
    %cst_82 = arith.constant 0.000000e+00 : f32
    %174 = vector.shape_cast %173 : vector<32x1xi1> to vector<32x1xi1>
    %175 = vector.broadcast %174 : vector<32x1xi1> to vector<32x64xi1>
    %176 = vector.broadcast %cst_82 : f32 to vector<32x64xf32>
    %177 = arith.select %175, %171, %176 : vector<32x64xi1>, vector<32x64xf32>
    %178 = arith.truncf %177 : vector<32x64xf32> to vector<32x64xbf16>
    %c0_83 = arith.constant 0 : index
    %c0_84 = arith.constant 0 : index
    %c0_85 = arith.constant 0 : index
    %179 = vector.load %arg3[%c0_83, %c0_84, %c0_85] : memref<3x64x256xbf16, #tpu.memory_space<vmem>>, vector<1x64x256xbf16>
    %180 = vector.shape_cast %179 : vector<1x64x256xbf16> to vector<64x256xbf16>
    %cst_86 = arith.constant dense<0.000000e+00> : vector<32x256xf32>
    %181 = tpu.matmul %178, %180, %cst_86 {dimension_numbers = #tpu.dot_dimension_numbers<[1], [0], [0], [1], [0, 0, 1, 1], [], []>} : vector<32x64xbf16>, vector<64x256xbf16>, vector<32x256xf32> -> vector<32x256xf32>
    %182 = arith.truncf %170 : vector<32x64xf32> to vector<32x64xbf16>
    %c1_87 = arith.constant 1 : index
    %c0_88 = arith.constant 0 : index
    %c0_89 = arith.constant 0 : index
    %183 = vector.load %arg3[%c1_87, %c0_88, %c0_89] : memref<3x64x256xbf16, #tpu.memory_space<vmem>>, vector<1x64x256xbf16>
    %184 = vector.shape_cast %183 : vector<1x64x256xbf16> to vector<64x256xbf16>
    %cst_90 = arith.constant dense<0.000000e+00> : vector<32x256xf32>
    %185 = tpu.matmul %182, %184, %cst_90 {dimension_numbers = #tpu.dot_dimension_numbers<[1], [0], [0], [1], [0, 0, 1, 1], [], []>} : vector<32x64xbf16>, vector<64x256xbf16>, vector<32x256xf32> -> vector<32x256xf32>
    %186 = arith.addf %181, %185 : vector<32x256xf32>
    %c31_i32_91 = arith.constant 31 : i32
    %187 = tpu.dynamic_rotate %170 by %c31_i32_91 dim 0 : vector<32x64xf32>, i32 -> vector<32x64xf32>
    %c14_i32_92 = arith.constant 14 : i32
    %188 = vector.broadcast %c14_i32_92 : i32 to vector<32x1xi32>
    %189 = arith.cmpi sle, %17, %188 : vector<32x1xi32>
    %cst_93 = arith.constant 0.000000e+00 : f32
    %190 = vector.shape_cast %189 : vector<32x1xi1> to vector<32x1xi1>
    %191 = vector.broadcast %190 : vector<32x1xi1> to vector<32x64xi1>
    %192 = vector.broadcast %cst_93 : f32 to vector<32x64xf32>
    %193 = arith.select %191, %187, %192 : vector<32x64xi1>, vector<32x64xf32>
    %194 = arith.truncf %193 : vector<32x64xf32> to vector<32x64xbf16>
    %c2_94 = arith.constant 2 : index
    %c0_95 = arith.constant 0 : index
    %c0_96 = arith.constant 0 : index
    %195 = vector.load %arg3[%c2_94, %c0_95, %c0_96] : memref<3x64x256xbf16, #tpu.memory_space<vmem>>, vector<1x64x256xbf16>
    %196 = vector.shape_cast %195 : vector<1x64x256xbf16> to vector<64x256xbf16>
    %cst_97 = arith.constant dense<0.000000e+00> : vector<32x256xf32>
    %197 = tpu.matmul %194, %196, %cst_97 {dimension_numbers = #tpu.dot_dimension_numbers<[1], [0], [0], [1], [0, 0, 1, 1], [], []>} : vector<32x64xbf16>, vector<64x256xbf16>, vector<32x256xf32> -> vector<32x256xf32>
    %198 = arith.addf %186, %197 : vector<32x256xf32>
    %199 = arith.addf %140, %198 : vector<32x256xf32>
    %c0_98 = arith.constant 0 : index
    %c0_99 = arith.constant 0 : index
    %200 = vector.load %arg16[%c0_98, %c0_99] : memref<1x64xf32, #tpu.memory_space<vmem>>, vector<1x64xf32>
    %c0_100 = arith.constant 0 : index
    %c0_101 = arith.constant 0 : index
    %201 = vector.load %arg17[%c0_100, %c0_101] : memref<1x64xf32, #tpu.memory_space<vmem>>, vector<1x64xf32>
    %c0_102 = arith.constant 0 : index
    %c0_103 = arith.constant 0 : index
    %202 = vector.load %arg7[%c0_102, %c0_103] : memref<64x64xf32, #tpu.memory_space<vmem>>, vector<64x64xf32>
    %cst_104 = arith.constant dense<0.000000e+00> : vector<64xf32>
    %203 = vector.multi_reduction <add>, %0, %cst_104 [0] : vector<32x64xf32> to vector<64xf32>
    %204 = vector.shape_cast %203 : vector<64xf32> to vector<1x64xf32>
    %205 = arith.mulf %0, %0 : vector<32x64xf32>
    %cst_105 = arith.constant dense<0.000000e+00> : vector<64xf32>
    %206 = vector.multi_reduction <add>, %205, %cst_105 [0] : vector<32x64xf32> to vector<64xf32>
    %207 = vector.shape_cast %206 : vector<64xf32> to vector<1x64xf32>
    %208 = tpu.concatenate %204, %207 in 0 : vector<1x64xf32>, vector<1x64xf32> -> vector<2x64xf32>
    %cst_106 = arith.constant dense<0.000000e+00> : vector<2x64xf32>
    %209 = tpu.matmul %208, %202, %cst_106 {dimension_numbers = #tpu.dot_dimension_numbers<[1], [0], [0], [1], [0, 0, 1, 1], [], []>} : vector<2x64xf32>, vector<64x64xf32>, vector<2x64xf32> -> vector<2x64xf32>
    %cst_107 = arith.constant 0.001953125 : f32
    %210 = vector.broadcast %cst_107 : f32 to vector<2x64xf32>
    %211 = arith.mulf %209, %210 : vector<2x64xf32>
    %212 = vector.extract_strided_slice %211 {offsets = [0, 0], sizes = [1, 64], strides = [1, 1]} : vector<2x64xf32> to vector<1x64xf32>
    %213 = vector.extract_strided_slice %211 {offsets = [1, 0], sizes = [1, 64], strides = [1, 1]} : vector<2x64xf32> to vector<1x64xf32>
    %214 = arith.mulf %212, %212 : vector<1x64xf32>
    %215 = arith.subf %213, %214 : vector<1x64xf32>
    %cst_108 = arith.constant 0.000000e+00 : f32
    %216 = vector.broadcast %cst_108 : f32 to vector<1x64xf32>
    %217 = arith.maximumf %215, %216 : vector<1x64xf32>
    %cst_109 = arith.constant 9.99999974E-6 : f32
    %218 = vector.broadcast %cst_109 : f32 to vector<1x64xf32>
    %219 = arith.addf %217, %218 : vector<1x64xf32>
    %220 = math.rsqrt %219 : vector<1x64xf32>
    %221 = arith.mulf %200, %220 : vector<1x64xf32>
    %222 = vector.broadcast %212 : vector<1x64xf32> to vector<32x64xf32>
    %223 = arith.subf %0, %222 : vector<32x64xf32>
    %224 = vector.broadcast %221 : vector<1x64xf32> to vector<32x64xf32>
    %225 = arith.mulf %223, %224 : vector<32x64xf32>
    %226 = vector.broadcast %201 : vector<1x64xf32> to vector<32x64xf32>
    %227 = arith.addf %225, %226 : vector<32x64xf32>
    %cst_110 = arith.constant 0.000000e+00 : f32
    %228 = vector.broadcast %cst_110 : f32 to vector<32x64xf32>
    %229 = arith.maximumf %227, %228 : vector<32x64xf32>
    %230 = arith.truncf %229 : vector<32x64xf32> to vector<32x64xbf16>
    %c0_111 = arith.constant 0 : index
    %c0_112 = arith.constant 0 : index
    %231 = vector.load %arg4[%c0_111, %c0_112] : memref<64x256xbf16, #tpu.memory_space<vmem>>, vector<64x256xbf16>
    %cst_113 = arith.constant dense<0.000000e+00> : vector<32x256xf32>
    %232 = tpu.matmul %230, %231, %cst_113 {dimension_numbers = #tpu.dot_dimension_numbers<[1], [0], [0], [1], [0, 0, 1, 1], [], []>} : vector<32x64xbf16>, vector<64x256xbf16>, vector<32x256xf32> -> vector<32x256xf32>
    %233 = arith.addf %199, %232 : vector<32x256xf32>
    %c0_114 = arith.constant 0 : index
    %c0_115 = arith.constant 0 : index
    %234 = vector.load %arg18[%c0_114, %c0_115] : memref<32x256xf32, #tpu.memory_space<vmem>>, vector<32x256xf32>
    tpu.vector_store %arg18[%c0_114, %c0_115], %233 {strides = array<i32>} : memref<32x256xf32, #tpu.memory_space<vmem>>, vector<32x256xf32>,
    return
  }
}

</mosaic_0001>

<bundles_post_ra>
// kernel: _residual_block_forward.1
= control target key start
LH: loop header
LB: loop body
LE: loop exit
PB: predicated region body
PF: predicated region fallthrough
CT: control target
= control target key end

     0   :  { %s3699_s0 = inlined_call_operand.vmem [shape: f32[32,64], index: 0, kind: input, shape index: {}]   ;;  %s3700_s1 = inlined_call_operand.vmem [shape: bf16[3,64,128], index: 1, kind: input, shape index: {}]   ;;  %s3701_s2 = inlined_call_operand.vmem [shape: bf16[3,128,64], index: 2, kind: input, shape index: {}]   ;;  %s3702_s3 = inlined_call_operand.vmem [shape: bf16[3,64,256], index: 3, kind: input, shape index: {}]   ;;  %s3703_s4 = inlined_call_operand.vmem [shape: bf16[64,256], index: 4, kind: input, shape index: {}]   ;;  %s3704_s5 = inlined_call_operand.vmem [shape: bf16[128,256], index: 5, kind: input, shape index: {}]   ;;  %s3705_s6 = inlined_call_operand.vmem [shape: bf16[64,256], index: 6, kind: input, shape index: {}]   ;;  %s3706_s7 = inlined_call_operand.vmem [shape: f32[64,64], index: 7, kind: input, shape index: {}]   ;;  %s3707_s8 = inlined_call_operand.vmem [shape: f32[128,128], index: 8, kind: input, shape index: {}]   ;;  %s3708_s9 = inlined_call_operand.hbm [shape: f32[64,64], index: 9, kind: input, shape index: {}]   ;;  %s3709_s10 = inlined_call_operand.vmem [shape: f32[1,64], index: 10, kind: input, shape index: {}]   ;;  %s3710_s11 = inlined_call_operand.hbm [shape: f32[1,64], index: 11, kind: input, shape index: {}]   ;;  %s3711_s12 = inlined_call_operand.vmem [shape: f32[1,128], index: 12, kind: input, shape index: {}]   ;;  %s3712_s13 = inlined_call_operand.hbm [shape: f32[1,128], index: 13, kind: input, shape index: {}]   ;;  %s3713_s14 = inlined_call_operand.vmem [shape: f32[1,64], index: 14, kind: input, shape index: {}]   ;;  %s3714_s15 = inlined_call_operand.hbm [shape: f32[1,64], index: 15, kind: input, shape index: {}]   ;;  %s3715_s16 = inlined_call_operand.vmem [shape: f32[1,64], index: 16, kind: input, shape index: {}]   ;;  %s3716_s17 = inlined_call_operand.vmem [shape: f32[1,64], index: 17, kind: input, shape index: {}]   ;;  %s3717_s18 = inlined_call_operand.vmem [shape: f32[32,256], index: 18, kind: output, shape index: {}]  }
   0x1   :  { %3721 = sst [smem:[#allocation12_spill]] %s3699_s0 }
   0x2   :  { %3722 = sst [smem:[#allocation13_spill]] %s3700_s1 }
   0x3   :  { %3723 = sst [smem:[#allocation14_spill]] %s3701_s2 }
   0x4   :  { %23 = vsyncpa [#allocation3], 0 }
   0x5   :  { %24 = vsyncpa [#allocation5], 0 }
   0x6   :  { %25 = vsyncpa [#allocation8], 0  ;;  %s2835_s27 = smov [#allocation4]   ;;  %s2836_s29 = smov [#allocation2]  }
   0x7   :  { %s64_s28 = sshll.u32 %s2835_s27, 4  ;;  %s49_s30 = sshll.u32 %s2836_s29, 4  ;;  %s65_s28 = int_to_ptr.vmem [resolvable:$true] %s64_s28  ;;  %s50_s30 = int_to_ptr.vmem [resolvable:$true] %s49_s30 }
   0x8   :  { %s2757_s0 = scalar_lea.vmem %s65_s28, 16  ;;  %s2761_s19 = scalar_lea.vmem %s65_s28, 32 }
   0x9   :  { %p2758_p0 = scmp.ne.s32.totalorder %s65_s28, %s2757_s0  ;;  %p2762_p1 = scmp.lt.s32.totalorder %s65_s28, %s65_s28 }
   0xa   :  { %p2763_p2 = scmp.lt.s32.totalorder %s2761_s19, %s2757_s0 }
   0xc   :  { %p2764_p3 = por %p2763_p2, %p2762_p1 }
   0xe   :  { %p2765_p4 = pnand %p2764_p3, %p2758_p0 }
  0x10   :  { %2768 = shalt.err (!%p2765_p4)
}
  0x11   :  { %67 = dma.hbm_to_vmem [thread:$0]  %s3710_s11, 16, %s65_s28, [#allocation5]  }
  0x12   :  { %s2777_s21 = scalar_lea.vmem %s50_s30, 1024  ;;  %p2782_p6 = scmp.lt.s32.totalorder %s50_s30, %s50_s30 }
  0x13   :  { %p2778_p5 = scmp.ne.s32.totalorder %s50_s30, %s2777_s21  ;;  %p2783_p7 = scmp.lt.s32.totalorder %s2777_s21, %s2777_s21 }
  0x15   :  { %p2784_p8 = por %p2783_p7, %p2782_p6 }
  0x17   :  { %p2785_p9 = pnand %p2784_p8, %p2778_p5 }
  0x19   :  { %2788 = shalt.err (!%p2785_p9)
}
  0x1a   :  { %s2837_s22 = smov 128   ;;  %s2838_s2 = smov 8  }
  0x1b   :  { %55 = dma.hbm_to_vmem [thread:$0]  %s3708_s9, 1024, %s50_s30, [#allocation3], %s2837_s22, %s2837_s22, %s2838_s2  }
  0x1c   :  { %s2839_s25 = smov [#allocation6]   ;;  %s2840_s27 = smov [#allocation7]  }
  0x1d   :  { %s76_s26 = sshll.u32 %s2839_s25, 4  ;;  %s88_s29 = sshll.u32 %s2840_s27, 4  ;;  %s77_s26 = int_to_ptr.vmem [resolvable:$true] %s76_s26  ;;  %s89_s29 = int_to_ptr.vmem [resolvable:$true] %s88_s29 }
  0x1e   :  { %s2797_s11 = scalar_lea.vmem %s77_s26, 16  ;;  %s2801_s28 = scalar_lea.vmem %s77_s26, 32 }
  0x1f   :  { %p2798_p10 = scmp.ne.s32.totalorder %s77_s26, %s2797_s11  ;;  %p2802_p11 = scmp.lt.s32.totalorder %s77_s26, %s77_s26 }
  0x20   :  { %p2803_p12 = scmp.lt.s32.totalorder %s2801_s28, %s2797_s11 }
  0x22   :  { %p2804_p13 = por %p2803_p12, %p2802_p11 }
  0x24   :  { %p2805_p0 = pnand %p2804_p13, %p2798_p10 }
  0x26   :  { %2808 = shalt.err (!%p2805_p0)
}
  0x27   :  { %79 = dma.hbm_to_vmem [thread:$0]  %s3712_s13, 16, %s77_s26, [#allocation5]  }
  0x28   :  { %s2817_s1 = scalar_lea.vmem %s89_s29, 16  ;;  %s2821_s9 = scalar_lea.vmem %s89_s29, 32 }
  0x29   :  { %p2818_p1 = scmp.ne.s32.totalorder %s89_s29, %s2817_s1  ;;  %p2822_p2 = scmp.lt.s32.totalorder %s89_s29, %s89_s29 }
  0x2a   :  { %p2823_p3 = scmp.lt.s32.totalorder %s2821_s9, %s2817_s1 }
  0x2c   :  { %p2824_p4 = por %p2823_p3, %p2822_p2 }
  0x2e   :  { %p2825_p5 = pnand %p2824_p4, %p2818_p1 }
  0x30   :  { %2828 = shalt.err (!%p2825_p5)
}
  0x31   :  { %91 = dma.hbm_to_vmem [thread:$0]  %s3714_s15, 16, %s89_s29, [#allocation8]  }
  0x32   :  { %2829 = dma.done.wait [#allocation3], 1024  }
  0x33   :  { %2830 = vsyncadd [#allocation3], 4294966272 }
  0x34   :  { %2831 = dma.done.wait [#allocation5], 32  }
  0x35   :  { %2832 = vsyncadd [#allocation5], 4294967264 }
  0x36   :  { %2833 = dma.done.wait [#allocation8], 16  }
  0x37   :  { %2834 = vsyncadd [#allocation8], 4294967280  ;;  %v2841_v0 = vmov 0.0   ;;  %vm2842_vm0 = vmmov 0   ;;  %v175_v1 = vld [vmem:[%s3706_s7 + $0x38] sm:$0xff]  ;;  %v174_v2 = vld [vmem:[%s3706_s7 + $0x30] sm:$0xff]  ;;  %v113_v63 = vlaneseq }
  0x38   :  { %2443 = vmatprep.subr.mxu0 %v2841_v0  ;;  %2459 = vmatprep.mubr.msk.f32.mxu0 %vm2842_vm0, %v2841_v0  ;;  %vm176_vm1 = vcmask 523264   ;;  %v173_v3 = vld [vmem:[%s3706_s7 + $0x28] sm:$0xff]  ;;  %v172_v4 = vld [vmem:[%s3706_s7 + $0x20] sm:$0xff]  ;;  %s3724_s29 = sld [smem:[#allocation12_spill]]  ;;  %v171_v11 = vld [vmem:[%s3706_s7 + $0x18] sm:$0xff]  ;;  %vm207_vm2 = vcmask 1040384  }
  0x39   :  { %2444 = vmatpush3.msra.mxu0 %v175_v1  ;;  %v170_v20 = vld [vmem:[%s3706_s7 + $0x10] sm:$0xff]  ;;  %v169_v26 = vld [vmem:[%s3706_s7 + $0x8] sm:$0xff]  ;;  %v168_v29 = vld [vmem:[%s3706_s7] sm:$0xff]  ;;  %s3725_s25 = sld [smem:[#allocation13_spill]]  ;;  %v2843_v61 = vmov 1966171168  }
  0x3a   :  { %2445 = vmatprep.subr.mxu0 %v2841_v0  ;;  %v293_v62 = vunpack.c.l.s4 %v2843_v61  ;;  %s3734_s15 = sld [smem:[#allocation14_spill]]  ;;  %vm2844_vm9 = vmmov 1  }
  0x3b   :  { %2446 = vmatpush3.msra.mxu0 %v174_v2  ;;  %v3060_v2 = vshrl.u32 %v113_v63, 7 }
  0x3c   :  { %2447 = vmatprep.subr.mxu0 %v2841_v0  ;;  %v294_v1 = vunpack.c.0.s8 %v293_v62 }
  0x3d   :  { %2448 = vmatpush3.msra.mxu0 %v173_v3  ;;  %vm345_vm3 = vcmp.lt.s32.totalorder %v3060_v2, 1  ;;  %vm549_vm4 = vcmp.lt.s32.totalorder %v3060_v2, 7 }
  0x3e   :  { %v2972_v5 = vld [vmem:[%s3724_s29] sm:$0xff]  ;;  %v2977_v6 = vld [vmem:[%s3724_s29 + $0x8] sm:$0xff]  ;;  %v2982_v7 = vld [vmem:[%s3724_s29 + $0x10] sm:$0xff]  ;;  %2449 = vmatprep.subr.mxu0 %v2841_v0  ;;  %v3063_v3 = vsub.s32 %v294_v1, %v3060_v2 }
  0x3f   :  { %v2987_v8 = vld [vmem:[%s3724_s29 + $0x18] sm:$0xff]  ;;  %v177_v9 = vsel %vm176_vm1, %v2972_v5, 0.0  ;;  %v190_v10 = vmul.f32 %v2972_v5, %v2972_v5  ;;  %v178_v12 = vsel %vm176_vm1, %v2977_v6, 0.0  ;;  %v180_v13 = vsel %vm176_vm1, %v2982_v7, 0.0  ;;  %2450 = vmatpush3.msra.mxu0 %v172_v4  ;;  %v2624_v45 = vld [vmem:[%s3725_s25 + $0x30] sm:$0xff]   ;;  %v2626_v48 = vld [vmem:[%s3725_s25 + $0x28] sm:$0xff]  }
  0x40   :  { %v182_v14 = vsel %vm176_vm1, %v2987_v8, 0.0  ;;  %v191_v15 = vmul.f32 %v2977_v6, %v2977_v6  ;;  %v179_v16 = vadd.f32 %v178_v12, %v177_v9  ;;  %v192_v17 = vmul.f32 %v2982_v7, %v2982_v7  ;;  %2451 = vmatprep.subr.mxu0 %v2841_v0  ;;  %v2623_v44 = vld [vmem:[%s3725_s25 + $0x38] sm:$0xff]   ;;  %v2627_v47 = vld [vmem:[%s3725_s25 + $0x10] sm:$0xff]   ;;  %v2629_v49 = vld [vmem:[%s3725_s25 + $0x8] sm:$0xff]  }
  0x41   :  { %v193_v18 = vmul.f32 %v2987_v8, %v2987_v8  ;;  %v194_v19 = vsel %vm176_vm1, %v190_v10, 0.0  ;;  %2452 = vmatpush3.msra.mxu0 %v171_v11  ;;  %2462 = vmatprep.subr.bf16.mxu1 %v2623_v44  ;;  %v2625_v46 = vld [vmem:[%s3725_s25 + $0x18] sm:$0xff]   ;;  %v2628_v50 = vld [vmem:[%s3725_s25 + $0x20] sm:$0xff]   ;;  %v3067_v10 = vsub.s32 0, %v3060_v2  ;;  %v116_v11 = vadd.s32 16, %v3060_v2  ;;  %v2632_v62 = vld [vmem:[%s3725_s25 + $0x50] sm:$0xff]  }
  0x42   :  { %v195_v21 = vsel %vm176_vm1, %v191_v15, 0.0  ;;  %v181_v22 = vadd.f32 %v180_v13, %v179_v16  ;;  %v197_v24 = vsel %vm176_vm1, %v192_v17, 0.0  ;;  %2453 = vmatprep.subr.mxu0 %v2841_v0  ;;  %2463 = vmatpush3.bf16.msra.mxu1 %v2623_v44  ;;  %v3053_v51 = vld [vmem:[%s3725_s25 + $0x58] sm:$0xff]   ;;  %v2631_v52 = vld [vmem:[%s3725_s25] sm:$0xff]   ;;  %v115_v15 = vadd.s32 8, %v3060_v2 }
  0x43   :  { %v196_v23 = vadd.f32 %v195_v21, %v194_v19  ;;  %v199_v25 = vsel %vm176_vm1, %v193_v18, 0.0  ;;  %2454 = vmatpush3.msra.mxu0 %v170_v20  ;;  %2464 = vmatprep.subr.bf16.mxu1 %v2624_v45  ;;  %v166_v13 = vld [vmem:[%s3709_s10] sm:$0x1]  ;;  %v136_v18 = vand.u32 15, %v116_v11  ;;  %v122_v21 = vand.u32 15, %v3060_v2 }
  0x44   :  { %v183_v27 = vadd.f32 %v182_v14, %v181_v22  ;;  %2455 = vmatprep.subr.mxu0 %v2841_v0  ;;  %v2011_v14 = vld [vmem:[%s3715_s16] sm:$0x1]  ;;  %v129_v22 = vand.u32 15, %v115_v15 }
  0x45   :  { %v198_v28 = vadd.f32 %v197_v24, %v196_v23  ;;  %2456 = vmatpush3.msra.mxu0 %v169_v26  ;;  %v3081_v23 = vadd.s32 24, %v3060_v2  ;;  %vm3094_vm5 = vcmp.ge.s32.totalorder %v136_v18, 1  ;;  %vm3104_vm6 = vcmp.ge.s32.totalorder %v122_v21, 1 }
  0x46   :  { %v184_v30 = vrot.slane %v183_v27, 4  ;;  %2457 = vmatprep.subr.mxu0 %v2841_v0  ;;  %2465 = vmatpush3.bf16.msra.mxu1 %v2624_v45  ;;  %vm3108_vm7 = vcmp.le.s32.totalorder %v129_v22, 14  ;;  %vm3309_vm10 = vmpackc.low %vm2844_vm9, %vm3104_vm6 }
  0x47   :  { %v200_v31 = vadd.f32 %v199_v25, %v198_v28  ;;  %2458 = vmatpush3.msra.mxu0 %v168_v29  ;;  %2466 = vmatprep.subr.bf16.mxu1 %v2626_v48  ;;  %vm2269_vm11 = vmpackc.low %vm3108_vm7, %vm2844_vm9 }
  0x48   :  { %v185_v32 = vadd.f32 %v184_v30, %v183_v27  ;;  %2474 = vmatprep.subr.bf16.mxu0 %v2625_v46  ;;  %v2171_v30 = vld [vmem:[#allocation4] ss:$0 sm:$0xff]  ;;  %vm2242_vm12 = vmpackc.low %vm2844_vm9, %vm3094_vm5 }
  0x49   :  { %v201_v33 = vrot.slane %v200_v31, 4 }
  0x4a   :  { %v186_v34 = vrot.slane %v185_v32, 2  ;;  %2467 = vmatpush3.bf16.msra.mxu1 %v2626_v48 }
  0x4b   :  { %v202_v35 = vadd.f32 %v201_v33, %v200_v31  ;;  %2468 = vmatprep.subr.bf16.mxu1 %v2628_v50  ;;  %v2349_v31 = vld [vmem:[%s3716_s17] ss:$0 sm:$0xff] }
  0x4c   :  { %v187_v36 = vadd.f32 %v186_v34, %v185_v32 }
  0x4d   :  { %v203_v37 = vrot.slane %v202_v35, 2 }
  0x4e   :  { %v188_v38 = vrot.slane %v187_v36, 1  ;;  %2469 = vmatpush3.bf16.msra.mxu1 %v2628_v50 }
  0x4f   :  { %v204_v39 = vadd.f32 %v203_v37, %v202_v35  ;;  %2486 = vmatprep.subr.bf16.mxu1 %v3053_v51 }
  0x50   :  { %v189_v40 = vadd.f32 %v188_v38, %v187_v36 }
  0x51   :  { %v205_v41 = vrot.slane %v204_v39, 1 }
  0x53   :  { %v206_v42 = vadd.f32 %v205_v41, %v204_v39 }
  0x55   :  { %v208_v43 = vsel %vm207_vm2, %v189_v40, %v206_v42 }
  0x56   :  { %2460 = vmatmul.mubr.msk.f32.vlgmr.msra.gmra.mxu0 %vm176_vm1, %v208_v43 }
  0x57   :  { %2475 = vmatpush3.bf16.msra.mxu0 %v2625_v46 }
  0x58   :  { %2476 = vmatprep.subr.bf16.mxu0 %v2627_v47 }
  0x5b   :  { %2477 = vmatpush3.bf16.msra.mxu0 %v2627_v47 }
  0x5c   :  { %2478 = vmatprep.subr.bf16.mxu0 %v2629_v49 }
  0x5f   :  { %2479 = vmatpush3.bf16.msra.mxu0 %v2629_v49 }
  0x60   :  { %2480 = vmatprep.subr.bf16.mxu0 %v2631_v52 }
  0x63   :  { %2481 = vmatpush3.bf16.msra.mxu0 %v2631_v52 }
  0x64   :  { %2498 = vmatprep.subr.mxu0 %v2841_v0 }
 0x116   :  { %v278_v53 = vpop.f32.mrf.mxu0 }
 0x117   :  { %v282_v54 = vmul.f32 0.001953125, %v278_v53 }
 0x118   :  { %v2461_v55 = vpop.f32.mrf.mxu0 }
 0x119   :  { %v283_v56 = vmul.f32 %v282_v54, %v282_v54  ;;  %v312_v16 = vrot.slane %v282_v54, %v3067_v10 }
 0x11b   :  { %v285_v57 = vrot.slane %v283_v56, 7  ;;  %v313_v24 = vsub.f32 %v2972_v5, %v312_v16  ;;  %v314_v25 = vsub.f32 %v2977_v6, %v312_v16  ;;  %v315_v28 = vsub.f32 %v2982_v7, %v312_v16  ;;  %v2742_v5 = vld [vmem:[%s3703_s4 + $0x4] ss:$8 sps:$4 sm:$0xff]  }
 0x11c   :  { %v316_v29 = vsub.f32 %v2987_v8, %v312_v16 }
 0x11d   :  { %v287_v58 = vsub.f32 %v282_v54, %v285_v57 }
 0x11f   :  { %v288_v59 = vmax.f32 %v287_v58, 0.0 }
 0x121   :  { %v289_v60 = vadd.f32 1e-05, %v288_v59 }
 0x123   :  { %2743 = vrsqrt.f32 %v289_v60 }
 0x130   :  { %v2744_v4 = vpop.eup %2743 }
 0x131   :  { %v298_v9 = vrot.slane %v2744_v4, %v3063_v3 }
 0x133   :  { %v299_v12 = vcombine.high %v298_v9, %v298_v9 }
 0x135   :  { %v306_v17 = vrot.slane %v299_v12, %v3063_v3 }
 0x137   :  { %v308_v19 = vmul.f32 %v306_v17, %v166_v13  ;;  %v2013_v20 = vmul.f32 %v2011_v14, %v306_v17 }
 0x139   :  { %v321_v26 = vrot.slane %v308_v19, %v3067_v10  ;;  %v2018_v27 = vrot.slane %v2013_v20, %v3067_v10 }
 0x13b   :  { %v323_v6 = vmul.f32 %v321_v26, %v313_v24  ;;  %v324_v32 = vmul.f32 %v321_v26, %v314_v25  ;;  %v2020_v33 = vmul.f32 %v2018_v27, %v313_v24  ;;  %v2021_v34 = vmul.f32 %v2018_v27, %v314_v25  ;;  %v2633_v24 = vld [vmem:[%s3725_s25 + $0x48] sm:$0xff]  }
 0x13c   :  { %v325_v35 = vmul.f32 %v321_v26, %v315_v28  ;;  %v326_v36 = vmul.f32 %v321_v26, %v316_v29  ;;  %v2022_v7 = vmul.f32 %v2018_v27, %v315_v28  ;;  %v2023_v37 = vmul.f32 %v2018_v27, %v316_v29  ;;  %v2634_v27 = vld [vmem:[%s3725_s25 + $0x40] sm:$0xff]  }
 0x13d   :  { %v333_v8 = vadd.f32 %v2171_v30, %v323_v6  ;;  %v334_v38 = vadd.f32 %v2171_v30, %v324_v32  ;;  %v2030_v39 = vadd.f32 %v2349_v31, %v2020_v33  ;;  %v2031_v40 = vadd.f32 %v2349_v31, %v2021_v34  ;;  %v699_v6 = vld [vmem:[%s3707_s8 + $0x78] sm:$0xff]  ;;  %v698_v32 = vld [vmem:[%s3707_s8 + $0x70] sm:$0xff]  ;;  %v697_v33 = vld [vmem:[%s3707_s8 + $0x68] sm:$0xff] }
 0x13e   :  { %v335_v41 = vadd.f32 %v2171_v30, %v325_v35  ;;  %v336_v42 = vadd.f32 %v2171_v30, %v326_v36  ;;  %v2032_v43 = vadd.f32 %v2349_v31, %v2022_v7  ;;  %v2033_v44 = vadd.f32 %v2349_v31, %v2023_v37  ;;  %v696_v34 = vld [vmem:[%s3707_s8 + $0x60] sm:$0xff]  ;;  %v695_v35 = vld [vmem:[%s3707_s8 + $0x58] sm:$0xff]  ;;  %v694_v36 = vld [vmem:[%s3707_s8 + $0x50] sm:$0xff] }
 0x13f   :  { %v337_v45 = vmax.f32 %v333_v8, 0.0  ;;  %v338_v46 = vmax.f32 %v334_v38, 0.0  ;;  %v2034_v47 = vmax.f32 %v2030_v39, 0.0  ;;  %v2035_v48 = vmax.f32 %v2031_v40, 0.0  ;;  %v693_v7 = vld [vmem:[%s3707_s8 + $0x48] sm:$0xff]  ;;  %v692_v37 = vld [vmem:[%s3707_s8 + $0x40] sm:$0xff] }
 0x140   :  { %v339_v49 = vmax.f32 %v335_v41, 0.0  ;;  %v340_v50 = vmax.f32 %v336_v42, 0.0  ;;  %v2036_v52 = vmax.f32 %v2032_v43, 0.0  ;;  %v2037_v53 = vmax.f32 %v2033_v44, 0.0  ;;  %v691_v8 = vld [vmem:[%s3707_s8 + $0x38] sm:$0xff]  ;;  %v690_v38 = vld [vmem:[%s3707_s8 + $0x30] sm:$0xff] }
 0x141   :  { %v341_v54 = vrot.slane %v337_v45, 7  ;;  %v342_v55 = vrot.slane %v338_v46, 7  ;;  %v376_v56 = vpack.c.bf16 %v338_v46, %v337_v45  ;;  %v545_v57 = vrot.slane %v337_v45, 1  ;;  %v689_v39 = vld [vmem:[%s3707_s8 + $0x28] sm:$0xff]  ;;  %v688_v40 = vld [vmem:[%s3707_s8 + $0x20] sm:$0xff]  ;;  %v687_v41 = vld [vmem:[%s3707_s8 + $0x18] sm:$0xff] }
 0x142   :  { %v546_v58 = vrot.slane %v338_v46, 1  ;;  %v3098_v59 = vpack.c.bf16 %v2035_v48, %v2034_v47  ;;  %v343_v60 = vrot.slane %v339_v49, 7  ;;  %v377_v61 = vpack.c.bf16 %v340_v50, %v339_v49  ;;  %v686_v42 = vld [vmem:[%s3707_s8 + $0x10] sm:$0xff]  ;;  %v685_v43 = vld [vmem:[%s3707_s8 + $0x8] sm:$0xff]  ;;  %v684_v44 = vld [vmem:[%s3707_s8] sm:$0xff] }
 0x143   :  { %2470 = vmatprep.mubr.msk.bf16.mxu1 %vm176_vm1, %v376_v56  ;;  %v344_v63 = vrot.slane %v340_v50, 7  ;;  %v547_v4 = vrot.slane %v339_v49, 1  ;;  %v348_v11 = vsel %vm345_vm3, %v341_v54, %v342_v55  ;;  %v3119_v14 = vpack.c.bf16 %v2037_v53, %v2036_v52 }
 0x144   :  { %2471 = vmatmul.mubr.msk.bf16.vlgmr.msra.gmra.mxu1 %vm176_vm1, %v377_v61  ;;  %v552_v12 = vsel %vm549_vm4, %v545_v57, %v546_v58  ;;  %v347_v13 = vsel %vm345_vm3, %v342_v55, %v343_v60  ;;  %v548_v25 = vrot.slane %v340_v50, 1  ;;  %v143_v26 = vand.u32 15, %v3081_v23 }
 0x145   :  { %2487 = vmatpush3.bf16.msra.mxu1 %v3053_v51  ;;  %v349_v15 = vsel %vm345_vm3, %v344_v63, %v341_v54  ;;  %v551_v16 = vsel %vm549_vm4, %v546_v58, %v547_v4  ;;  %v346_v17 = vsel %vm345_vm3, %v343_v60, %v344_v63  ;;  %v364_v18 = vsel %vm3094_vm5, %v347_v13, 0.0 }
 0x146   :  { %v362_v19 = vsel %vm3104_vm6, %v349_v15, 0.0  ;;  %2488 = vmatprep.subr.bf16.mxu1 %v2632_v62  ;;  %v567_v20 = vsel %vm3108_vm7, %v551_v16, 0.0  ;;  %v367_v51 = vpack.c.bf16 %v346_v17, %v364_v18  ;;  %v553_v28 = vsel %vm549_vm4, %v548_v25, %v545_v57 }
 0x147   :  { %v366_v21 = vpack.c.bf16 %v348_v11, %v362_v19  ;;  %v570_v22 = vpack.c.bf16 %v567_v20, %v552_v12  ;;  %vm3148_vm8 = vcmp.le.s32.totalorder %v143_v26, 14  ;;  %v550_v23 = vsel %vm549_vm4, %v547_v4, %v548_v25 }
 0x148   :  { %v569_v30 = vsel %vm3148_vm8, %v553_v28, 0.0  ;;  %vm2272_vm13 = vmpackc.low %vm3148_vm8, %vm2844_vm9 }
 0x149   :  { %2482 = vmatprep.mubr.msk.bf16.mxu0 %vm176_vm1, %v366_v21  ;;  %2494 = vmatprep.mubr.msk.bf16.mxu1 %vm176_vm1, %v570_v22  ;;  %v571_v31 = vpack.c.bf16 %v569_v30, %v550_v23 }
 0x14a   :  { %2483 = vmatmul.mubr.msk.bf16.vlgmr.msra.gmra.mxu0 %vm176_vm1, %v367_v51  ;;  %2489 = vmatpush3.bf16.msra.mxu1 %v2632_v62 }
 0x14b   :  { %2490 = vmatprep.subr.bf16.mxu1 %v2633_v24  ;;  %2530 = vmatprep.mubr.msk.f32.mxu0 %vm2842_vm0, %v2841_v0 }
 0x14c   :  { %2499 = vmatpush3.msra.mxu0 %v699_v6 }
 0x14d   :  { %2500 = vmatprep.subr.mxu0 %v2841_v0 }
 0x14e   :  { %2491 = vmatpush3.bf16.msra.mxu1 %v2633_v24  ;;  %2501 = vmatpush3.msra.mxu0 %v698_v32 }
 0x14f   :  { %2492 = vmatprep.subr.bf16.mxu1 %v2634_v27  ;;  %2502 = vmatprep.subr.mxu0 %v2841_v0 }
 0x150   :  { %2503 = vmatpush3.msra.mxu0 %v697_v33 }
 0x151   :  { %2504 = vmatprep.subr.mxu0 %v2841_v0 }
 0x152   :  { %2493 = vmatpush3.bf16.msra.mxu1 %v2634_v27  ;;  %2505 = vmatpush3.msra.mxu0 %v696_v34 }
 0x153   :  { %2506 = vmatprep.subr.mxu0 %v2841_v0 }
 0x154   :  { %2507 = vmatpush3.msra.mxu0 %v695_v35 }
 0x155   :  { %2495 = vmatmul.mubr.msk.bf16.vlgmr.msra.gmra.mxu1 %vm176_vm1, %v571_v31  ;;  %2508 = vmatprep.subr.mxu0 %v2841_v0 }
 0x156   :  { %2509 = vmatpush3.msra.mxu0 %v694_v36  ;;  %v2635_v36 = vld [vmem:[%s3734_s15 + $0x78] sm:$0xff]  }
 0x157   :  { %2510 = vmatprep.subr.mxu0 %v2841_v0  ;;  %2533 = vmatprep.subr.bf16.mxu1 %v2635_v36 }
 0x158   :  { %2511 = vmatpush3.msra.mxu0 %v693_v7  ;;  %2534 = vmatpush3.bf16.msra.mxu1 %v2635_v36  ;;  %v2636_v7 = vld [vmem:[%s3734_s15 + $0x70] sm:$0xff]  }
 0x159   :  { %2512 = vmatprep.subr.mxu0 %v2841_v0  ;;  %2535 = vmatprep.subr.bf16.mxu1 %v2636_v7 }
 0x15a   :  { %2513 = vmatpush3.msra.mxu0 %v692_v37  ;;  %v2637_v37 = vld [vmem:[%s3734_s15 + $0x38] sm:$0xff]  }
 0x15b   :  { %2514 = vmatprep.subr.mxu0 %v2841_v0 }
 0x15c   :  { %2515 = vmatpush3.msra.mxu0 %v691_v8  ;;  %2536 = vmatpush3.bf16.msra.mxu1 %v2636_v7  ;;  %v2638_v8 = vld [vmem:[%s3734_s15 + $0x68] sm:$0xff]  }
 0x15d   :  { %2516 = vmatprep.subr.mxu0 %v2841_v0  ;;  %2537 = vmatprep.subr.bf16.mxu1 %v2638_v8 }
 0x15e   :  { %2517 = vmatpush3.msra.mxu0 %v690_v38  ;;  %v2639_v38 = vld [vmem:[%s3734_s15 + $0x30] sm:$0xff]  }
 0x15f   :  { %2518 = vmatprep.subr.mxu0 %v2841_v0 }
 0x160   :  { %2519 = vmatpush3.msra.mxu0 %v689_v39  ;;  %2538 = vmatpush3.bf16.msra.mxu1 %v2638_v8  ;;  %v2640_v39 = vld [vmem:[%s3734_s15 + $0x60] sm:$0xff]  }
 0x161   :  { %2520 = vmatprep.subr.mxu0 %v2841_v0  ;;  %2539 = vmatprep.subr.bf16.mxu1 %v2640_v39 }
 0x162   :  { %2521 = vmatpush3.msra.mxu0 %v688_v40  ;;  %v2641_v40 = vld [vmem:[%s3734_s15 + $0x28] sm:$0xff]  }
 0x163   :  { %2522 = vmatprep.subr.mxu0 %v2841_v0 }
 0x164   :  { %2523 = vmatpush3.msra.mxu0 %v687_v41  ;;  %2540 = vmatpush3.bf16.msra.mxu1 %v2640_v39  ;;  %v2642_v41 = vld [vmem:[%s3734_s15 + $0x58] sm:$0xff]  }
 0x165   :  { %2524 = vmatprep.subr.mxu0 %v2841_v0  ;;  %2541 = vmatprep.subr.bf16.mxu1 %v2642_v41 }
 0x166   :  { %2525 = vmatpush3.msra.mxu0 %v686_v42  ;;  %v2643_v42 = vld [vmem:[%s3734_s15 + $0x20] sm:$0xff]  }
 0x167   :  { %2526 = vmatprep.subr.mxu0 %v2841_v0 }
 0x168   :  { %2527 = vmatpush3.msra.mxu0 %v685_v43  ;;  %v2644_v43 = vld [vmem:[%s3734_s15 + $0x50] sm:$0xff]   ;;  %2542 = vmatpush3.bf16.msra.mxu1 %v2642_v41 }
 0x169   :  { %2528 = vmatprep.subr.mxu0 %v2841_v0  ;;  %2543 = vmatprep.subr.bf16.mxu1 %v2644_v43  ;;  %v2652_v41 = vld [vmem:[%s3734_s15 + $0xb0] sm:$0xff]  }
 0x16a   :  { %2529 = vmatpush3.msra.mxu0 %v684_v44  ;;  %v2645_v44 = vld [vmem:[%s3734_s15 + $0x18] sm:$0xff]  }
 0x16b   :  { %2553 = vmatprep.subr.bf16.mxu0 %v2637_v37 }
 0x16c   :  { %2544 = vmatpush3.bf16.msra.mxu1 %v2644_v43 }
 0x204   :  { %v2472_v45 = vpop.f32.mrf.mxu1 }
 0x206   :  { %v451_v46 = vpop.f32.mrf.mxu1 }
 0x208   :  { %v2473_v48 = vpop.f32.mrf.mxu1 }
 0x20a   :  { %v2484_v47 = vpop.f32.mrf.mxu0  ;;  %v454_v50 = vpop.f32.mrf.mxu1 }
 0x20b   :  { %v539_v58 = vadd.f32 %v2484_v47, %v2472_v45  ;;  %v2646_v45 = vld [vmem:[%s3734_s15 + $0x48] sm:$0xff]   ;;  %v2648_v47 = vld [vmem:[%s3734_s15 + $0x40] sm:$0xff]  }
 0x20c   :  { %v530_v49 = vpop.f32.mrf.mxu0  ;;  %2545 = vmatprep.subr.bf16.mxu1 %v2646_v45 }
 0x20d   :  { %v531_v56 = vadd.f32 %v530_v49, %v451_v46  ;;  %v2647_v46 = vld [vmem:[%s3734_s15 + $0x10] sm:$0xff]   ;;  %2546 = vmatpush3.bf16.msra.mxu1 %v2646_v45  ;;  %v2650_v49 = vld [vmem:[%s3734_s15] sm:$0xff]  }
 0x20e   :  { %v2485_v52 = vpop.f32.mrf.mxu0  ;;  %2547 = vmatprep.subr.bf16.mxu1 %v2648_v47 }
 0x20f   :  { %v542_v63 = vadd.f32 %v2485_v52, %v2473_v48  ;;  %v2649_v48 = vld [vmem:[%s3734_s15 + $0x8] sm:$0xff]  }
 0x210   :  { %v533_v54 = vpop.f32.mrf.mxu0 }
 0x211   :  { %v534_v60 = vadd.f32 %v533_v54, %v454_v50  ;;  %2548 = vmatpush3.bf16.msra.mxu1 %v2648_v47  ;;  %v2651_v50 = vld [vmem:[%s3734_s15 + $0xb8] sm:$0xff]  }
 0x212   :  { %2573 = vmatprep.subr.bf16.mxu1 %v2651_v50 }
 0x215   :  { %v2496_v53 = vpop.f32.mrf.mxu1 }
 0x216   :  { %v3222_v4 = vadd.f32 %v2496_v53, %v539_v58 }
 0x217   :  { %v645_v55 = vpop.f32.mrf.mxu1 }
 0x218   :  { %v3220_v61 = vadd.f32 %v645_v55, %v531_v56  ;;  %v711_v17 = vmul.f32 %v3222_v4, %v3222_v4 }
 0x219   :  { %v2497_v57 = vpop.f32.mrf.mxu1 }
 0x21a   :  { %v709_v12 = vmul.f32 %v3220_v61, %v3220_v61  ;;  %v3228_v13 = vadd.f32 %v2497_v57, %v542_v63 }
 0x21b   :  { %v648_v62 = vpop.f32.mrf.mxu1 }
 0x21c   :  { %v3224_v11 = vadd.f32 %v648_v62, %v534_v60  ;;  %v712_v20 = vmul.f32 %v3228_v13, %v3228_v13 }
 0x21e   :  { %v700_v15 = vadd.f32 %v3224_v11, %v3220_v61  ;;  %v710_v16 = vmul.f32 %v3224_v11, %v3224_v11 }
 0x220   :  { %v701_v18 = vadd.f32 %v700_v15, %v3222_v4  ;;  %v713_v19 = vadd.f32 %v710_v16, %v709_v12  ;;  %v682_v16 = vld [vmem:[%s3711_s12] sm:$0x1] }
 0x222   :  { %v702_v51 = vadd.f32 %v701_v18, %v3228_v13  ;;  %v714_v21 = vadd.f32 %v713_v19, %v711_v17 }
 0x224   :  { %v703_v22 = vrot.slane %v702_v51, 4  ;;  %v715_v24 = vadd.f32 %v714_v21, %v712_v20 }
 0x226   :  { %v704_v25 = vadd.f32 %v703_v22, %v702_v51  ;;  %v716_v26 = vrot.slane %v715_v24, 4 }
 0x228   :  { %v705_v27 = vrot.slane %v704_v25, 2  ;;  %v717_v28 = vadd.f32 %v716_v26, %v715_v24  ;;  %v2206_v24 = vld [vmem:[#allocation6] ss:$0 sm:$0xff] }
 0x22a   :  { %v706_v23 = vadd.f32 %v705_v27, %v704_v25  ;;  %v718_v30 = vrot.slane %v717_v28, 2 }
 0x22c   :  { %v707_v31 = vrot.slane %v706_v23, 1  ;;  %v719_v6 = vadd.f32 %v718_v30, %v717_v28 }
 0x22e   :  { %v720_v32 = vrot.slane %v719_v6, 1  ;;  %v708_v33 = vadd.f32 %v707_v31, %v706_v23 }
 0x230   :  { %v721_v34 = vadd.f32 %v720_v32, %v719_v6 }
 0x232   :  { %v722_v35 = vsel %vm207_vm2, %v708_v33, %v721_v34 }
 0x233   :  { %2531 = vmatmul.mubr.f32.vlgmr.msra.gmra.mxu0 %v722_v35 }
 0x234   :  { %2554 = vmatpush3.bf16.msra.mxu0 %v2637_v37 }
 0x235   :  { %2555 = vmatprep.subr.bf16.mxu0 %v2639_v38 }
 0x238   :  { %2556 = vmatpush3.bf16.msra.mxu0 %v2639_v38 }
 0x239   :  { %2557 = vmatprep.subr.bf16.mxu0 %v2641_v40 }
 0x23c   :  { %2558 = vmatpush3.bf16.msra.mxu0 %v2641_v40 }
 0x23d   :  { %2559 = vmatprep.subr.bf16.mxu0 %v2643_v42 }
 0x240   :  { %2560 = vmatpush3.bf16.msra.mxu0 %v2643_v42 }
 0x241   :  { %2561 = vmatprep.subr.bf16.mxu0 %v2645_v44 }
 0x244   :  { %2562 = vmatpush3.bf16.msra.mxu0 %v2645_v44 }
 0x245   :  { %2563 = vmatprep.subr.bf16.mxu0 %v2647_v46 }
 0x248   :  { %2564 = vmatpush3.bf16.msra.mxu0 %v2647_v46 }
 0x249   :  { %2565 = vmatprep.subr.bf16.mxu0 %v2649_v48 }
 0x24c   :  { %2566 = vmatpush3.bf16.msra.mxu0 %v2649_v48 }
 0x24d   :  { %2567 = vmatprep.subr.bf16.mxu0 %v2650_v49 }
 0x250   :  { %2568 = vmatpush3.bf16.msra.mxu0 %v2650_v49 }
 0x2f3   :  { %v789_v52 = vpop.f32.mrf.mxu0 }
 0x2f4   :  { %v793_v53 = vmul.f32 0.001953125, %v789_v52 }
 0x2f5   :  { %v2532_v54 = vpop.f32.mrf.mxu0 }
 0x2f6   :  { %v794_v55 = vmul.f32 %v793_v53, %v793_v53  ;;  %v823_v15 = vrot.slane %v793_v53, %v3067_v10 }
 0x2f8   :  { %v796_v56 = vrot.slane %v794_v55, 7  ;;  %v826_v19 = vsub.f32 %v3222_v4, %v823_v15  ;;  %v827_v20 = vsub.f32 %v3228_v13, %v823_v15  ;;  %v824_v51 = vsub.f32 %v3220_v61, %v823_v15 }
 0x2f9   :  { %v825_v21 = vsub.f32 %v3224_v11, %v823_v15  ;;  %v2661_v15 = vld [vmem:[%s3704_s5 + $0x74] ss:$8 sps:$4 sm:$0xff]  }
 0x2fa   :  { %v798_v57 = vsub.f32 %v793_v53, %v796_v56  ;;  %v2653_v56 = vld [vmem:[%s3734_s15 + $0xa8] sm:$0xff]  }
 0x2fc   :  { %v799_v58 = vmax.f32 %v798_v57, 0.0  ;;  %v2654_v57 = vld [vmem:[%s3734_s15 + $0xa0] sm:$0xff]  }
 0x2fe   :  { %v800_v60 = vadd.f32 1e-05, %v799_v58  ;;  %v2655_v58 = vld [vmem:[%s3734_s15 + $0x98] sm:$0xff]  }
 0x300   :  { %2745 = vrsqrt.f32 %v800_v60  ;;  %v2656_v60 = vld [vmem:[%s3734_s15 + $0x90] sm:$0xff]  }
 0x30d   :  { %v2746_v62 = vpop.eup %2745 }
 0x30e   :  { %v809_v63 = vrot.slane %v2746_v62, %v3063_v3  ;;  %v2657_v62 = vld [vmem:[%s3734_s15 + $0x88] sm:$0xff]  }
 0x310   :  { %v810_v12 = vcombine.high %v809_v63, %v809_v63  ;;  %v2658_v63 = vld [vmem:[%s3734_s15 + $0x80] sm:$0xff]  }
 0x312   :  { %v817_v17 = vrot.slane %v810_v12, %v3063_v3 }
 0x314   :  { %v819_v18 = vmul.f32 %v817_v17, %v682_v16 }
 0x316   :  { %v832_v22 = vrot.slane %v819_v18, %v3067_v10  ;;  %v2659_v18 = vld [vmem:[%s3704_s5 + $0x70] ss:$8 sps:$4 sm:$0xff]  }
 0x318   :  { %v834_v25 = vmul.f32 %v832_v22, %v824_v51  ;;  %v835_v26 = vmul.f32 %v832_v22, %v825_v21  ;;  %v836_v27 = vmul.f32 %v832_v22, %v826_v19  ;;  %v837_v28 = vmul.f32 %v832_v22, %v827_v20  ;;  %v2664_v20 = vld [vmem:[%s3704_s5 + $0x64] ss:$8 sps:$4 sm:$0xff]   ;;  %v2662_v51 = vld [vmem:[%s3704_s5 + $0x60] ss:$8 sps:$4 sm:$0xff]   ;;  %v2667_v21 = vld [vmem:[%s3704_s5 + $0x54] ss:$8 sps:$4 sm:$0xff]  }
 0x319   :  { %v2665_v22 = vld [vmem:[%s3704_s5 + $0x50] ss:$8 sps:$4 sm:$0xff]  }
 0x31a   :  { %v844_v23 = vadd.f32 %v2206_v24, %v834_v25  ;;  %v845_v30 = vadd.f32 %v2206_v24, %v835_v26  ;;  %v846_v31 = vadd.f32 %v2206_v24, %v836_v27  ;;  %v847_v6 = vadd.f32 %v2206_v24, %v837_v28  ;;  %v2670_v24 = vld [vmem:[%s3704_s5 + $0x44] ss:$8 sps:$4 sm:$0xff]   ;;  %v2668_v25 = vld [vmem:[%s3704_s5 + $0x40] ss:$8 sps:$4 sm:$0xff]   ;;  %v2673_v26 = vld [vmem:[%s3704_s5 + $0x34] ss:$8 sps:$4 sm:$0xff]  }
 0x31b   :  { %v2671_v27 = vld [vmem:[%s3704_s5 + $0x30] ss:$8 sps:$4 sm:$0xff]   ;;  %v2676_v28 = vld [vmem:[%s3704_s5 + $0x24] ss:$8 sps:$4 sm:$0xff]  }
 0x31c   :  { %v848_v32 = vmax.f32 %v844_v23, 0.0  ;;  %v849_v33 = vmax.f32 %v845_v30, 0.0  ;;  %v850_v34 = vmax.f32 %v846_v31, 0.0  ;;  %v851_v35 = vmax.f32 %v847_v6, 0.0  ;;  %v2674_v23 = vld [vmem:[%s3704_s5 + $0x20] ss:$8 sps:$4 sm:$0xff]  }
 0x31d   :  { %v2679_v30 = vld [vmem:[%s3704_s5 + $0x14] ss:$8 sps:$4 sm:$0xff]   ;;  %v2677_v31 = vld [vmem:[%s3704_s5 + $0x10] ss:$8 sps:$4 sm:$0xff]   ;;  %v2682_v6 = vld [vmem:[%s3704_s5 + $0x4] ss:$8 sps:$4 sm:$0xff]  }
 0x31e   :  { %v882_v36 = vpack.c.bf16 %v849_v33, %v848_v32  ;;  %v854_v7 = vrot.slane %v850_v34, 7  ;;  %v883_v37 = vpack.c.bf16 %v851_v35, %v850_v34  ;;  %v852_v8 = vrot.slane %v848_v32, 7 }
 0x31f   :  { %v853_v38 = vrot.slane %v849_v33, 7  ;;  %v855_v39 = vrot.slane %v851_v35, 7  ;;  %v1095_v40 = vrot.slane %v848_v32, 1  ;;  %v1096_v43 = vrot.slane %v849_v33, 1  ;;  %v2680_v32 = vld [vmem:[%s3704_s5] ss:$8 sps:$4 sm:$0xff]  }
 0x320   :  { %2549 = vmatprep.mubr.bf16.mxu1 %v882_v36  ;;  %v1097_v44 = vrot.slane %v850_v34, 1  ;;  %v1098_v12 = vrot.slane %v851_v35, 1  ;;  %v664_v33 = vpack.c.bf16 %v3224_v11, %v3220_v61  ;;  %v665_v34 = vpack.c.bf16 %v3228_v13, %v3222_v4  ;;  %v2683_v35 = vld [vmem:[%s3705_s6 + $0x30] ss:$8 sps:$4 sm:$0xff]   ;;  %v2685_v36 = vld [vmem:[%s3705_s6 + $0x34] ss:$8 sps:$4 sm:$0xff]  }
 0x321   :  { %2550 = vmatmul.mubr.bf16.vlgmr.msra.gmra.mxu1 %v883_v37  ;;  %v858_v45 = vsel %vm345_vm3, %v852_v8, %v853_v38  ;;  %v859_v46 = vsel %vm345_vm3, %v855_v39, %v852_v8  ;;  %v856_v47 = vsel %vm345_vm3, %v854_v7, %v855_v39  ;;  %v857_v48 = vsel %vm345_vm3, %v853_v38, %v854_v7  ;;  %v2688_v61 = vld [vmem:[%s3705_s6 + $0x24] ss:$8 sps:$4 sm:$0xff]   ;;  %v2686_v4 = vld [vmem:[%s3705_s6 + $0x20] ss:$8 sps:$4 sm:$0xff]   ;;  %v2691_v11 = vld [vmem:[%s3705_s6 + $0x14] ss:$8 sps:$4 sm:$0xff]  }
 0x322   :  { %2574 = vmatpush3.bf16.msra.mxu1 %v2651_v50  ;;  %v2240_v49 = vpack.c.bf16 %v858_v45, %v859_v46  ;;  %v1100_v52 = vsel %vm549_vm4, %v1096_v43, %v1097_v44  ;;  %v1101_v53 = vsel %vm549_vm4, %v1095_v40, %v1096_v43  ;;  %v2243_v54 = vpack.c.bf16 %v856_v47, %v857_v48  ;;  %v2689_v13 = vld [vmem:[%s3705_s6 + $0x10] ss:$8 sps:$4 sm:$0xff]   ;;  %v2694_v7 = vld [vmem:[%s3705_s6 + $0x4] ss:$8 sps:$4 sm:$0xff]   ;;  %v2692_v37 = vld [vmem:[%s3705_s6] ss:$8 sps:$4 sm:$0xff]  }
 0x323   :  { %v2270_v55 = vpack.c.bf16 %v1100_v52, %v1101_v53  ;;  %2575 = vmatprep.subr.bf16.mxu1 %v2652_v41  ;;  %v2845_v50 = vmov 0   ;;  %v1099_v16 = vsel %vm549_vm4, %v1097_v44, %v1098_v12  ;;  %v1102_v17 = vsel %vm549_vm4, %v1098_v12, %v1095_v40  ;;  %1291 = vmatprep.subr.bf16.mxu0 %v2685_v36 }
 0x324   :  { %2569 = vmatprep.mubr.msk.bf16.mxu0 %vm3309_vm10, %v2240_v49  ;;  %v2273_v19 = vpack.c.bf16 %v1102_v17, %v1099_v16  ;;  %v1478_v17 = vld [vmem:[#allocation2 + $0x38] sm:$0xff] }
 0x325   :  { %2589 = vmatprep.mubr.msk.bf16.mxu1 %vm2269_vm11, %v2270_v55  ;;  %2570 = vmatmul.mubr.msk.bf16.vlgmr.msra.gmra.mxu0 %vm2242_vm12, %v2243_v54 }
 0x326   :  { %2576 = vmatpush3.bf16.msra.mxu1 %v2652_v41  ;;  %1315 = vmatprep.mubr.bf16.mxu0 %v2845_v50 }
 0x327   :  { %2577 = vmatprep.subr.bf16.mxu1 %v2653_v56  ;;  %1292 = vmatpush1.bf16.msra.mxu0 %v2683_v35  ;;  %v1474_v35 = vld [vmem:[#allocation2 + $0x18] sm:$0xff] }
 0x328   :  { %1293 = vmatprep.subr.bf16.mxu0 %v2688_v61 }
 0x32a   :  { %2578 = vmatpush3.bf16.msra.mxu1 %v2653_v56 }
 0x32b   :  { %2579 = vmatprep.subr.bf16.mxu1 %v2654_v57  ;;  %1294 = vmatpush1.bf16.msra.mxu0 %v2686_v4  ;;  %v1473_v4 = vld [vmem:[#allocation2 + $0x10] sm:$0xff] }
 0x32c   :  { %1295 = vmatprep.subr.bf16.mxu0 %v2691_v11 }
 0x32e   :  { %2580 = vmatpush3.bf16.msra.mxu1 %v2654_v57 }
 0x32f   :  { %2581 = vmatprep.subr.bf16.mxu1 %v2655_v58  ;;  %1296 = vmatpush1.bf16.msra.mxu0 %v2689_v13 }
 0x330   :  { %1297 = vmatprep.subr.bf16.mxu0 %v2694_v7  ;;  %v1472_v7 = vld [vmem:[#allocation2 + $0x8] sm:$0xff] }
 0x332   :  { %2582 = vmatpush3.bf16.msra.mxu1 %v2655_v58 }
 0x333   :  { %2583 = vmatprep.subr.bf16.mxu1 %v2656_v60  ;;  %1298 = vmatpush1.bf16.msra.mxu0 %v2692_v37 }
 0x334   :  { %2593 = vmatprep.subr.mxu0 %v2841_v0 }
 0x336   :  { %2584 = vmatpush3.bf16.msra.mxu1 %v2656_v60 }
 0x337   :  { %2585 = vmatprep.subr.bf16.mxu1 %v2657_v62 }
 0x33a   :  { %2586 = vmatpush3.bf16.msra.mxu1 %v2657_v62 }
 0x33b   :  { %2587 = vmatprep.subr.bf16.mxu1 %v2658_v63 }
 0x33e   :  { %2588 = vmatpush3.bf16.msra.mxu1 %v2658_v63 }
 0x33f   :  { %1416 = vmatprep.subr.bf16.mxu1 %v2661_v15 }
 0x341   :  { %2590 = vmatmul.mubr.msk.bf16.vlgmr.msra.gmra.mxu1 %vm2272_vm13, %v2273_v19 }
 0x342   :  { %1417 = vmatpush1.bf16.msra.mxu1 %v2659_v18  ;;  %1448 = vmatprep.mubr.bf16.mxu1 %v2845_v50 }
 0x343   :  { %1418 = vmatprep.subr.bf16.mxu1 %v2664_v20 }
 0x346   :  { %1419 = vmatpush1.bf16.msra.mxu1 %v2662_v51 }
 0x347   :  { %1420 = vmatprep.subr.bf16.mxu1 %v2667_v21 }
 0x34a   :  { %1421 = vmatpush1.bf16.msra.mxu1 %v2665_v22  ;;  %v1477_v22 = vld [vmem:[#allocation2 + $0x30] sm:$0xff] }
 0x34b   :  { %1422 = vmatprep.subr.bf16.mxu1 %v2670_v24 }
 0x34e   :  { %1423 = vmatpush1.bf16.msra.mxu1 %v2668_v25 }
 0x34f   :  { %1424 = vmatprep.subr.bf16.mxu1 %v2673_v26 }
 0x352   :  { %1425 = vmatpush1.bf16.msra.mxu1 %v2671_v27 }
 0x353   :  { %1426 = vmatprep.subr.bf16.mxu1 %v2676_v28  ;;  %v1476_v28 = vld [vmem:[#allocation2 + $0x28] sm:$0xff] }
 0x356   :  { %1427 = vmatpush1.bf16.msra.mxu1 %v2674_v23 }
 0x357   :  { %1428 = vmatprep.subr.bf16.mxu1 %v2679_v30 }
 0x35a   :  { %1429 = vmatpush1.bf16.msra.mxu1 %v2677_v31 }
 0x35b   :  { %1430 = vmatprep.subr.bf16.mxu1 %v2682_v6  ;;  %v1475_v6 = vld [vmem:[#allocation2 + $0x20] sm:$0xff] }
 0x35e   :  { %1431 = vmatpush1.bf16.msra.mxu1 %v2680_v32 }
 0x361   :  { %1449 = vmatmul.mubr.bf16.vlgmr.msra.gmra.mxu1 %v664_v33 }
 0x362   :  { %1458 = vmatprep.mubr.bf16.mxu1 %v2845_v50 }
 0x369   :  { %1459 = vmatmul.mubr.bf16.gmra.mxu1 %v665_v34 }
 0x36a   :  { %1852 = vmatprep.mubr.bf16.mxu1 %v2845_v50 }
 0x3e1   :  { %v2551_v8 = vpop.f32.mrf.mxu1 }
 0x3e3   :  { %v983_v38 = vpop.f32.mrf.mxu1 }
 0x3e5   :  { %v2571_v39 = vpop.f32.mrf.mxu0  ;;  %v2552_v40 = vpop.f32.mrf.mxu1 }
 0x3e6   :  { %v1089_v46 = vadd.f32 %v2571_v39, %v2551_v8 }
 0x3e7   :  { %v1080_v41 = vpop.f32.mrf.mxu0  ;;  %v986_v42 = vpop.f32.mrf.mxu1 }
 0x3e8   :  { %v1081_v45 = vadd.f32 %v1080_v41, %v983_v38  ;;  %v1471_v38 = vld [vmem:[#allocation2] sm:$0xff] }
 0x3e9   :  { %v2572_v43 = vpop.f32.mrf.mxu0 }
 0x3ea   :  { %v1092_v54 = vadd.f32 %v2572_v43, %v2552_v40 }
 0x3eb   :  { %v1083_v47 = vpop.f32.mrf.mxu0 }
 0x3ec   :  { %v1084_v55 = vadd.f32 %v1083_v47, %v986_v42  ;;  %v2703_v47 = vld [vmem:[%s3702_s3 + $0x34] ss:$8 sps:$4 sm:$0xff]  }
 0x3ed   :  { %1828 = vmatprep.subr.bf16.mxu1 %v2703_v47 }
 0x401   :  { %v2591_v44 = vpop.f32.mrf.mxu1 }
 0x402   :  { %v3441_v52 = vadd.f32 %v2591_v44, %v1089_v46  ;;  %v2695_v46 = vld [vmem:[%s3702_s3 + $0x70] ss:$8 sps:$4 sm:$0xff]  }
 0x403   :  { %v1208_v48 = vpop.f32.mrf.mxu1 }
 0x404   :  { %v3439_v49 = vadd.f32 %v1208_v48, %v1081_v45  ;;  %v1494_v62 = vmul.f32 %v3441_v52, %v3441_v52  ;;  %v1482_v19 = vsel %vm176_vm1, %v3441_v52, 0.0  ;;  %v2697_v45 = vld [vmem:[%s3702_s3 + $0x74] ss:$8 sps:$4 sm:$0xff]   ;;  %v2698_v48 = vld [vmem:[%s3702_s3 + $0x60] ss:$8 sps:$4 sm:$0xff]  }
 0x405   :  { %v2592_v53 = vpop.f32.mrf.mxu1 }
 0x406   :  { %v1492_v57 = vmul.f32 %v3439_v49, %v3439_v49  ;;  %v3445_v58 = vadd.f32 %v2592_v53, %v1092_v54  ;;  %v1479_v63 = vsel %vm176_vm1, %v3439_v49, 0.0  ;;  %v1499_v26 = vsel %vm176_vm1, %v1494_v62, 0.0  ;;  %v2701_v53 = vld [vmem:[%s3702_s3 + $0x30] ss:$8 sps:$4 sm:$0xff]   ;;  %v2706_v54 = vld [vmem:[%s3702_s3 + $0x54] ss:$8 sps:$4 sm:$0xff]  }
 0x407   :  { %v1211_v56 = vpop.f32.mrf.mxu1  ;;  %1829 = vmatpush1.bf16.msra.mxu1 %v2701_v53  ;;  %v2712_v62 = vld [vmem:[%s3702_s3 + $0x44] ss:$8 sps:$4 sm:$0xff]  }
 0x408   :  { %v3447_v60 = vadd.f32 %v1211_v56, %v1084_v55  ;;  %v1496_v20 = vsel %vm176_vm1, %v1492_v57, 0.0  ;;  %v1495_v51 = vmul.f32 %v3445_v58, %v3445_v58  ;;  %v1484_v27 = vsel %vm176_vm1, %v3445_v58, 0.0  ;;  %v2709_v55 = vld [vmem:[%s3702_s3 + $0x24] ss:$8 sps:$4 sm:$0xff]   ;;  %v2704_v56 = vld [vmem:[%s3702_s3 + $0x50] ss:$8 sps:$4 sm:$0xff]  }
 0x409   :  { %v1228_v34 = vpack.c.bf16 %v3445_v58, %v3441_v52  ;;  %v2707_v57 = vld [vmem:[%s3702_s3 + $0x20] ss:$8 sps:$4 sm:$0xff]   ;;  %1830 = vmatprep.subr.bf16.mxu1 %v2709_v55 }
 0x40a   :  { %v1227_v12 = vpack.c.bf16 %v3447_v60, %v3439_v49  ;;  %v1480_v15 = vsel %vm176_vm1, %v3447_v60, 0.0  ;;  %v1493_v16 = vmul.f32 %v3447_v60, %v3447_v60  ;;  %v1501_v31 = vsel %vm176_vm1, %v1495_v51, 0.0 }
 0x40b   :  { %v1481_v18 = vadd.f32 %v1480_v15, %v1479_v63  ;;  %1831 = vmatpush1.bf16.msra.mxu1 %v2707_v57  ;;  %v2715_v63 = vld [vmem:[%s3702_s3 + $0x14] ss:$8 sps:$4 sm:$0xff]   ;;  %v2713_v15 = vld [vmem:[%s3702_s3 + $0x10] ss:$8 sps:$4 sm:$0xff]  }
 0x40c   :  { %v1497_v21 = vsel %vm176_vm1, %v1493_v16, 0.0  ;;  %2283 = vmatmul.mubr.msk.bf16.vlgmr.msra.gmra.mxu0 %vm176_vm1, %v1227_v12  ;;  %v2710_v12 = vld [vmem:[%s3702_s3 + $0x40] ss:$8 sps:$4 sm:$0xff]   ;;  %1832 = vmatprep.subr.bf16.mxu1 %v2715_v63  ;;  %v2718_v16 = vld [vmem:[%s3702_s3 + $0x4] ss:$8 sps:$4 sm:$0xff]  }
 0x40d   :  { %v1483_v24 = vadd.f32 %v1482_v19, %v1481_v18  ;;  %v1498_v25 = vadd.f32 %v1497_v21, %v1496_v20  ;;  %2594 = vmatpush3.msra.mxu0 %v1478_v17  ;;  %1325 = vmatprep.mubr.bf16.mxu0 %v2845_v50  ;;  %v2716_v17 = vld [vmem:[%s3702_s3] ss:$8 sps:$4 sm:$0xff]   ;;  %v2721_v18 = vld [vmem:[%s3702_s3 + $0xb4] ss:$8 sps:$4 sm:$0xff]  }
 0x40e   :  { %2595 = vmatprep.subr.mxu0 %v2841_v0  ;;  %v2727_v19 = vld [vmem:[%s3703_s4 + $0x34] ss:$8 sps:$4 sm:$0xff]  }
 0x40f   :  { %v1485_v23 = vadd.f32 %v1484_v27, %v1483_v24  ;;  %v1500_v30 = vadd.f32 %v1499_v26, %v1498_v25  ;;  %2596 = vmatpush3.msra.mxu0 %v1477_v22  ;;  %1833 = vmatpush1.bf16.msra.mxu1 %v2713_v15  ;;  %v2725_v15 = vld [vmem:[%s3703_s4 + $0x30] ss:$8 sps:$4 sm:$0xff]  }
 0x410   :  { %2597 = vmatprep.subr.mxu0 %v2841_v0  ;;  %1834 = vmatprep.subr.bf16.mxu1 %v2718_v16 }
 0x411   :  { %v1486_v32 = vrot.slane %v1485_v23, 4  ;;  %v1502_v33 = vadd.f32 %v1501_v31, %v1500_v30  ;;  %2598 = vmatpush3.msra.mxu0 %v1476_v28 }
 0x412   :  { %2599 = vmatprep.subr.mxu0 %v2841_v0 }
 0x413   :  { %v1487_v36 = vadd.f32 %v1486_v32, %v1485_v23  ;;  %v1503_v61 = vrot.slane %v1502_v33, 4  ;;  %2600 = vmatpush3.msra.mxu0 %v1475_v6  ;;  %1835 = vmatpush1.bf16.msra.mxu1 %v2716_v17 }
 0x414   :  { %2284 = vmatmul.mubr.msk.bf16.gmra.mxu0 %vm176_vm1, %v1228_v34  ;;  %2601 = vmatprep.subr.mxu0 %v2841_v0 }
 0x415   :  { %2602 = vmatpush3.msra.mxu0 %v1474_v35  ;;  %2609 = vmatprep.mubr.msk.f32.mxu0 %vm2842_vm0, %v2841_v0  ;;  %v1488_v11 = vrot.slane %v1487_v36, 2  ;;  %v1504_v13 = vadd.f32 %v1503_v61, %v1502_v33 }
 0x416   :  { %2603 = vmatprep.subr.mxu0 %v2841_v0  ;;  %2102 = vmatprep.subr.bf16.mxu1 %v2727_v19  ;;  %v2733_v19 = vld [vmem:[%s3703_s4 + $0x24] ss:$8 sps:$4 sm:$0xff]  }
 0x417   :  { %2604 = vmatpush3.msra.mxu0 %v1473_v4  ;;  %v1489_v37 = vadd.f32 %v1488_v11, %v1487_v36  ;;  %v1505_v8 = vrot.slane %v1504_v13, 2  ;;  %v1469_v4 = vld [vmem:[%s3713_s14] sm:$0x1] }
 0x418   :  { %2605 = vmatprep.subr.mxu0 %v2841_v0 }
 0x419   :  { %2606 = vmatpush3.msra.mxu0 %v1472_v7  ;;  %v1490_v39 = vrot.slane %v1489_v37, 1  ;;  %v1506_v40 = vadd.f32 %v1505_v8, %v1504_v13 }
 0x41a   :  { %2607 = vmatprep.subr.mxu0 %v2841_v0  ;;  %v2700_v0 = vld [vmem:[%s3702_s3 + $0x64] ss:$8 sps:$4 sm:$0xff]  }
 0x41b   :  { %2608 = vmatpush3.msra.mxu0 %v1471_v38  ;;  %v1507_v41 = vrot.slane %v1506_v40, 1  ;;  %v1491_v42 = vadd.f32 %v1490_v39, %v1489_v37 }
 0x41c   :  { %1729 = vmatprep.subr.bf16.mxu0 %v2697_v45 }
 0x41d   :  { %v1508_v43 = vadd.f32 %v1507_v41, %v1506_v40  ;;  %v2302_v41 = vld [vmem:[#allocation7] ss:$0 sm:$0xff] }
 0x41f   :  { %v1509_v44 = vsel %vm207_vm2, %v1491_v42, %v1508_v43 }
 0x420   :  { %2610 = vmatmul.mubr.msk.f32.vlgmr.msra.gmra.mxu0 %vm176_vm1, %v1509_v44 }
 0x421   :  { %1753 = vmatprep.mubr.bf16.mxu0 %v2845_v50  ;;  %1730 = vmatpush1.bf16.msra.mxu0 %v2695_v46 }
 0x422   :  { %1731 = vmatprep.subr.bf16.mxu0 %v2700_v0 }
 0x425   :  { %1732 = vmatpush1.bf16.msra.mxu0 %v2698_v48 }
 0x426   :  { %1733 = vmatprep.subr.bf16.mxu0 %v2706_v54 }
 0x429   :  { %1734 = vmatpush1.bf16.msra.mxu0 %v2704_v56  ;;  %v2724_v56 = vld [vmem:[%s3702_s3 + $0xa4] ss:$8 sps:$4 sm:$0xff]  }
 0x42a   :  { %1735 = vmatprep.subr.bf16.mxu0 %v2712_v62 }
 0x42d   :  { %1736 = vmatpush1.bf16.msra.mxu0 %v2710_v12  ;;  %v2722_v12 = vld [vmem:[%s3702_s3 + $0xa0] ss:$8 sps:$4 sm:$0xff]  }
 0x42e   :  { %1950 = vmatprep.subr.bf16.mxu0 %v2721_v18  ;;  %v2730_v18 = vld [vmem:[%s3702_s3 + $0x94] ss:$8 sps:$4 sm:$0xff]  }
 0x4cc   :  { %v3540_v20 = vpop.f32.mrf.mxu0 }
 0x4ce   :  { %v3542_v51 = vpop.f32.mrf.mxu0 }
 0x4d0   :  { %v3544_v21 = vpop.f32.mrf.mxu0 }
 0x4d2   :  { %v3546_v22 = vpop.f32.mrf.mxu0 }
 0x4d4   :  { %v3548_v24 = vpop.f32.mrf.mxu0 }
 0x4d6   :  { %v3550_v25 = vpop.f32.mrf.mxu0 }
 0x4d8   :  { %v3552_v26 = vpop.f32.mrf.mxu0 }
 0x4da   :  { %v3554_v27 = vpop.f32.mrf.mxu0 }
 0x4e0   :  { %v1579_v28 = vpop.f32.mrf.mxu0 }
 0x4e1   :  { %v1583_v23 = vmul.f32 0.001953125, %v1579_v28 }
 0x4e2   :  { %v2611_v30 = vpop.f32.mrf.mxu0 }
 0x4e3   :  { %v1584_v31 = vmul.f32 %v1583_v23, %v1583_v23  ;;  %v1613_v11 = vrot.slane %v1583_v23, %v3067_v10  ;;  %v2728_v30 = vld [vmem:[%s3702_s3 + $0x90] ss:$8 sps:$4 sm:$0xff]  }
 0x4e5   :  { %v1586_v6 = vrot.slane %v1584_v31, 7  ;;  %v1614_v37 = vsub.f32 %v3439_v49, %v1613_v11  ;;  %v1615_v8 = vsub.f32 %v3447_v60, %v1613_v11  ;;  %v1616_v38 = vsub.f32 %v3441_v52, %v1613_v11  ;;  %v2731_v31 = vld [vmem:[%s3703_s4 + $0x20] ss:$8 sps:$4 sm:$0xff]  }
 0x4e6   :  { %v1617_v39 = vsub.f32 %v3445_v58, %v1613_v11  ;;  %v2737_v11 = vld [vmem:[%s3703_s4 + $0x10] ss:$8 sps:$4 sm:$0xff]  }
 0x4e7   :  { %v1588_v32 = vsub.f32 %v1583_v23, %v1586_v6 }
 0x4e9   :  { %v1589_v33 = vmax.f32 %v1588_v32, 0.0  ;;  %v2736_v32 = vld [vmem:[%s3702_s3 + $0x84] ss:$8 sps:$4 sm:$0xff]  }
 0x4eb   :  { %v1590_v34 = vadd.f32 1e-05, %v1589_v33  ;;  %v2739_v33 = vld [vmem:[%s3703_s4 + $0x14] ss:$8 sps:$4 sm:$0xff]  }
 0x4ed   :  { %2747 = vrsqrt.f32 %v1590_v34 }
 0x4fa   :  { %v2748_v35 = vpop.eup %2747 }
 0x4fb   :  { %v1599_v36 = vrot.slane %v2748_v35, %v3063_v3 }
 0x4fd   :  { %v1600_v61 = vcombine.high %v1599_v36, %v1599_v36 }
 0x4ff   :  { %v1607_v13 = vrot.slane %v1600_v61, %v3063_v3 }
 0x501   :  { %v1609_v7 = vmul.f32 %v1607_v13, %v1469_v4  ;;  %v2734_v4 = vld [vmem:[%s3702_s3 + $0x80] ss:$8 sps:$4 sm:$0xff]  }
 0x503   :  { %v1622_v40 = vrot.slane %v1609_v7, %v3067_v10  ;;  %v2719_v10 = vld [vmem:[%s3702_s3 + $0xb0] ss:$8 sps:$4 sm:$0xff]  }
 0x505   :  { %v1624_v42 = vmul.f32 %v1622_v40, %v1614_v37  ;;  %v1625_v43 = vmul.f32 %v1622_v40, %v1615_v8  ;;  %v1627_v44 = vmul.f32 %v1622_v40, %v1617_v39  ;;  %v1626_v45 = vmul.f32 %v1622_v40, %v1616_v38  ;;  %v2740_v38 = vld [vmem:[%s3703_s4] ss:$8 sps:$4 sm:$0xff]  }
 0x507   :  { %v1637_v46 = vadd.f32 %v2302_v41, %v1627_v44  ;;  %v1634_v0 = vadd.f32 %v2302_v41, %v1624_v42  ;;  %v1635_v47 = vadd.f32 %v2302_v41, %v1625_v43  ;;  %v1636_v3 = vadd.f32 %v2302_v41, %v1626_v45  ;;  %v1450_v43 = vpop.f32.mrf.mxu1 }
 0x509   :  { %v3567_v48 = vmax.f32 %v1637_v46, 0.0  ;;  %v3569_v49 = vmax.f32 %v1634_v0, 0.0  ;;  %v1639_v60 = vmax.f32 %v1635_v47, 0.0  ;;  %v3571_v53 = vmax.f32 %v1636_v3, 0.0  ;;  %v1452_v44 = vpop.f32.mrf.mxu1 }
 0x50b   :  { %v1645_v52 = vrot.slane %v3567_v48, 7  ;;  %v1642_v58 = vrot.slane %v3569_v49, 7  ;;  %v1643_v54 = vrot.slane %v1639_v60, 7  ;;  %v1664_v55 = vpack.c.bf16 %v1639_v60, %v3569_v49  ;;  %v1454_v45 = vpop.f32.mrf.mxu1 }
 0x50c   :  { %v1644_v63 = vrot.slane %v3571_v53, 7  ;;  %v1874_v28 = vrot.slane %v1639_v60, 1  ;;  %v1875_v23 = vrot.slane %v3571_v53, 1  ;;  %v1665_v6 = vpack.c.bf16 %v3567_v48, %v3571_v53 }
 0x50d   :  { %2319 = vmatmul.mubr.msk.bf16.vlgmr.msra.gmra.mxu0 %vm176_vm1, %v1664_v55  ;;  %v1648_v57 = vsel %vm345_vm3, %v1642_v58, %v1643_v54  ;;  %v1649_v62 = vsel %vm345_vm3, %v1645_v52, %v1642_v58  ;;  %v1873_v34 = vrot.slane %v3569_v49, 1  ;;  %v1876_v8 = vrot.slane %v3567_v48, 1  ;;  %v1456_v46 = vpop.f32.mrf.mxu1 }
 0x50e   :  { %1951 = vmatpush1.bf16.msra.mxu0 %v2719_v10  ;;  %v1650_v16 = vsel %vm3104_vm6, %v1649_v62, 0.0  ;;  %1763 = vmatprep.mubr.bf16.mxu0 %v2845_v50  ;;  %v1647_v1 = vsel %vm345_vm3, %v1643_v54, %v1644_v63  ;;  %v1646_v35 = vsel %vm345_vm3, %v1644_v63, %v1645_v52  ;;  %v1878_v61 = vsel %vm549_vm4, %v1874_v28, %v1875_v23 }
 0x50f   :  { %1952 = vmatprep.subr.bf16.mxu0 %v2724_v56  ;;  %v1654_v17 = vpack.c.bf16 %v1648_v57, %v1650_v16  ;;  %v1652_v36 = vsel %vm3094_vm5, %v1647_v1, 0.0  ;;  %v1879_v7 = vsel %vm549_vm4, %v1873_v34, %v1874_v28  ;;  %v1882_v37 = vsel %vm3108_vm7, %v1878_v61, 0.0  ;;  %v1460_v2 = vpop.f32.mrf.mxu1 }
 0x510   :  { %v1655_v13 = vpack.c.bf16 %v1646_v35, %v1652_v36  ;;  %v1885_v39 = vpack.c.bf16 %v1882_v37, %v1879_v7  ;;  %v1880_v9 = vsel %vm549_vm4, %v1876_v8, %v1873_v34  ;;  %v1877_v40 = vsel %vm549_vm4, %v1875_v23, %v1876_v8 }
 0x511   :  { %2329 = vmatmul.mubr.msk.bf16.vlgmr.msra.gmra.mxu1 %vm176_vm1, %v1654_v17  ;;  %v1884_v41 = vsel %vm3148_vm8, %v1880_v9, 0.0  ;;  %v1462_v0 = vpop.f32.mrf.mxu1  ;;  %v1457_v36 = vadd.f32 %v1456_v46, %v3546_v22 }
 0x512   :  { %1953 = vmatpush1.bf16.msra.mxu0 %v2722_v12  ;;  %2103 = vmatpush1.bf16.msra.mxu1 %v2725_v15  ;;  %v1886_v42 = vpack.c.bf16 %v1884_v41, %v1877_v40  ;;  %v1451_v12 = vadd.f32 %v1450_v43, %v3540_v20 }
 0x513   :  { %1954 = vmatprep.subr.bf16.mxu0 %v2730_v18  ;;  %2104 = vmatprep.subr.bf16.mxu1 %v2733_v19  ;;  %v1464_v47 = vpop.f32.mrf.mxu1  ;;  %v1453_v19 = vadd.f32 %v1452_v44, %v3542_v51 }
 0x514   :  { %1862 = vmatprep.mubr.bf16.mxu1 %v2845_v50  ;;  %v1465_v44 = vadd.f32 %v1464_v47, %v3552_v26 }
 0x515   :  { %2320 = vmatmul.mubr.msk.bf16.gmra.mxu0 %vm176_vm1, %v1665_v6  ;;  %v3664_v3 = vpop.f32.mrf.mxu1 }
 0x516   :  { %1955 = vmatpush1.bf16.msra.mxu0 %v2728_v30  ;;  %2105 = vmatpush1.bf16.msra.mxu1 %v2731_v31  ;;  %v1455_v30 = vadd.f32 %v1454_v45, %v3544_v21  ;;  %v1461_v21 = vadd.f32 %v1460_v2, %v3548_v24 }
 0x517   :  { %1956 = vmatprep.subr.bf16.mxu0 %v2736_v32  ;;  %2106 = vmatprep.subr.bf16.mxu1 %v2739_v33 }
 0x518   :  { %1974 = vmatprep.mubr.bf16.mxu0 %v2845_v50 }
 0x519   :  { %2330 = vmatmul.mubr.msk.bf16.gmra.mxu1 %vm176_vm1, %v1655_v13 }
 0x51a   :  { %1957 = vmatpush1.bf16.msra.mxu0 %v2734_v4  ;;  %2107 = vmatpush1.bf16.msra.mxu1 %v2737_v11 }
 0x51b   :  { %2108 = vmatprep.subr.bf16.mxu1 %v2742_v5  ;;  %2126 = vmatprep.mubr.bf16.mxu1 %v2845_v50 }
 0x51d   :  { %2347 = vmatmul.mubr.msk.bf16.vlgmr.msra.gmra.mxu0 %vm176_vm1, %v1885_v39  ;;  %v1463_v39 = vadd.f32 %v1462_v0, %v3550_v25 }
 0x51e   :  { %2109 = vmatpush1.bf16.msra.mxu1 %v2740_v38  ;;  %1984 = vmatprep.mubr.bf16.mxu0 %v2845_v50 }
 0x521   :  { %2358 = vmatmul.mubr.msk.bf16.vlgmr.msra.gmra.mxu1 %vm176_vm1, %v3098_v59 }
 0x522   :  { %2136 = vmatprep.mubr.bf16.mxu1 %v2845_v50 }
 0x525   :  { %2348 = vmatmul.mubr.msk.bf16.gmra.mxu0 %vm176_vm1, %v1886_v42 }
 0x529   :  { %2359 = vmatmul.mubr.msk.bf16.gmra.mxu1 %vm176_vm1, %v3119_v14 }
 0x5cd   :  { %v1755_v29 = vpop.f32.mrf.mxu0 }
 0x5cf   :  { %v1757_v48 = vpop.f32.mrf.mxu0 }
 0x5d1   :  { %v1759_v59 = vpop.f32.mrf.mxu0  ;;  %v1854_v49 = vpop.f32.mrf.mxu1 }
 0x5d2   :  { %v1855_v57 = vadd.f32 %v1854_v49, %v1755_v29  ;;  %v1467_v49 = vadd.f32 %v3664_v3, %v3554_v27 }
 0x5d3   :  { %v1761_v50 = vpop.f32.mrf.mxu0  ;;  %v1856_v60 = vpop.f32.mrf.mxu1 }
 0x5d4   :  { %v1857_v15 = vadd.f32 %v1856_v60, %v1757_v48 }
 0x5d5   :  { %v1765_v53 = vpop.f32.mrf.mxu0  ;;  %v1858_v10 = vpop.f32.mrf.mxu1 }
 0x5d6   :  { %v1859_v28 = vadd.f32 %v1858_v10, %v1759_v59 }
 0x5d7   :  { %v1767_v52 = vpop.f32.mrf.mxu0  ;;  %v1860_v58 = vpop.f32.mrf.mxu1 }
 0x5d8   :  { %v1861_v32 = vadd.f32 %v1860_v58, %v1761_v50 }
 0x5d9   :  { %v1769_v14 = vpop.f32.mrf.mxu0  ;;  %v1864_v54 = vpop.f32.mrf.mxu1 }
 0x5da   :  { %v1865_v4 = vadd.f32 %v1864_v54, %v1765_v53 }
 0x5db   :  { %v1771_v55 = vpop.f32.mrf.mxu0  ;;  %v1866_v56 = vpop.f32.mrf.mxu1 }
 0x5dc   :  { %v1867_v37 = vadd.f32 %v1866_v56, %v1767_v52 }
 0x5dd   :  { %v1868_v62 = vpop.f32.mrf.mxu1  ;;  %v1976_v63 = vpop.f32.mrf.mxu0 }
 0x5de   :  { %v1995_v16 = vadd.f32 %v1976_v63, %v1855_v57  ;;  %v1869_v41 = vadd.f32 %v1868_v62, %v1769_v14 }
 0x5df   :  { %v1870_v17 = vpop.f32.mrf.mxu1  ;;  %v1978_v18 = vpop.f32.mrf.mxu0 }
 0x5e0   :  { %v1996_v23 = vadd.f32 %v1978_v18, %v1857_v15  ;;  %v2003_v1 = vadd.f32 %v1995_v16, %v1451_v12  ;;  %v1871_v2 = vadd.f32 %v1870_v17, %v1771_v55 }
 0x5e1   :  { %v1980_v31 = vpop.f32.mrf.mxu0  ;;  %v2128_v6 = vpop.f32.mrf.mxu1 }
 0x5e2   :  { %v1997_v33 = vadd.f32 %v1980_v31, %v1859_v28  ;;  %v2147_v34 = vadd.f32 %v2128_v6, %v2003_v1  ;;  %v2004_v35 = vadd.f32 %v1996_v23, %v1453_v19 }
 0x5e3   :  { %v1982_v20 = vpop.f32.mrf.mxu0  ;;  %v2130_v61 = vpop.f32.mrf.mxu1 }
 0x5e4   :  { %2155 = vst [vmem:[%s3717_s18] sm:$0xff] %v2147_v34  ;;  %v1998_v51 = vadd.f32 %v1982_v20, %v1861_v32  ;;  %v2148_v11 = vadd.f32 %v2130_v61, %v2004_v35  ;;  %v2005_v13 = vadd.f32 %v1997_v33, %v1455_v30 }
 0x5e5   :  { %v1986_v5 = vpop.f32.mrf.mxu0  ;;  %v2132_v7 = vpop.f32.mrf.mxu1 }
 0x5e6   :  { %2156 = vst [vmem:[%s3717_s18 + $0x8] sm:$0xff] %v2148_v11  ;;  %v1999_v22 = vadd.f32 %v1986_v5, %v1865_v4  ;;  %v2149_v8 = vadd.f32 %v2132_v7, %v2005_v13  ;;  %v2006_v38 = vadd.f32 %v1998_v51, %v1457_v36 }
 0x5e7   :  { %v1988_v9 = vpop.f32.mrf.mxu0  ;;  %v2134_v40 = vpop.f32.mrf.mxu1 }
 0x5e8   :  { %2157 = vst [vmem:[%s3717_s18 + $0x10] sm:$0xff] %v2149_v8  ;;  %v2000_v24 = vadd.f32 %v1988_v9, %v1867_v37  ;;  %v2150_v42 = vadd.f32 %v2134_v40, %v2006_v38  ;;  %v2007_v43 = vadd.f32 %v1999_v22, %v1461_v21 }
 0x5e9   :  { %v1990_v45 = vpop.f32.mrf.mxu0  ;;  %v2138_v46 = vpop.f32.mrf.mxu1 }
 0x5ea   :  { %2158 = vst [vmem:[%s3717_s18 + $0x18] sm:$0xff] %v2150_v42  ;;  %v2001_v25 = vadd.f32 %v1990_v45, %v1869_v41  ;;  %v2151_v0 = vadd.f32 %v2138_v46, %v2007_v43  ;;  %v2008_v29 = vadd.f32 %v2000_v24, %v1463_v39 }
 0x5eb   :  { %v1992_v48 = vpop.f32.mrf.mxu0  ;;  %v2140_v59 = vpop.f32.mrf.mxu1 }
 0x5ec   :  { %2159 = vst [vmem:[%s3717_s18 + $0x20] sm:$0xff] %v2151_v0  ;;  %v2002_v26 = vadd.f32 %v1992_v48, %v1871_v2  ;;  %v2152_v47 = vadd.f32 %v2140_v59, %v2008_v29  ;;  %v2009_v50 = vadd.f32 %v2001_v25, %v1465_v44 }
 0x5ed   :  { %v2142_v60 = vpop.f32.mrf.mxu1 }
 0x5ee   :  { %2160 = vst [vmem:[%s3717_s18 + $0x28] sm:$0xff] %v2152_v47  ;;  %v2153_v53 = vadd.f32 %v2142_v60, %v2009_v50  ;;  %v2010_v10 = vadd.f32 %v2002_v26, %v1467_v49 }
 0x5ef   :  { %v2144_v52 = vpop.f32.mrf.mxu1 }
 0x5f0   :  { %2161 = vst [vmem:[%s3717_s18 + $0x30] sm:$0xff] %v2153_v53  ;;  %v2154_v27 = vadd.f32 %v2144_v52, %v2010_v10 }
 0x5f2   :  { %2162 = vst [vmem:[%s3717_s18 + $0x38] sm:$0xff] %v2154_v27 }
 0x5f3   :  { %2167 = vsyncpa [#allocation3], 1 }
 0x5f4   :  { %2168 = vsyncpa [#allocation5], 1 }
 0x5f5   :  { %2169 = vsyncpa [#allocation8], 1 }

</bundles_post_ra>
